<compile_context>
chip_gen: v5e
topology: v5e:2x2
jax: 0.10.0
libtpu: 0.0.40
codegen_flags: <defaults>
</compile_context>

<pallas_src>
import functools

import jax
import jax.numpy as jnp
import numpy as np
from jax import lax
from jax.experimental import pallas as pl
from jax.experimental.pallas import tpu as pltpu

EPS = 1e-5  # PyTorch BatchNorm2d default eps

# Sub-pixel phase taps for ConvTranspose2d(kernel=4, stride=2, padding=1).
# Output pixel (2*iy + py, 2*ix + px) receives, per phase (py, px), exactly
# four taps: x[iy + dy, ix + dx] * w[:, :, ky, kx].  Entries are (ky, kx, dy, dx),
# phases ordered p = 2*py + px.
PHASE_TAPS = (
    ((1, 1, 0, 0), (3, 1, -1, 0), (1, 3, 0, -1), (3, 3, -1, -1)),  # (even y, even x)
    ((1, 2, 0, 0), (3, 2, -1, 0), (1, 0, 0, 1), (3, 0, -1, 1)),    # (even y, odd  x)
    ((2, 1, 0, 0), (0, 1, 1, 0), (2, 3, 0, -1), (0, 3, 1, -1)),    # (odd  y, even x)
    ((2, 2, 0, 0), (0, 2, 1, 0), (2, 0, 0, 1), (0, 0, 1, 1)),      # (odd  y, odd  x)
)


# -----------------------------------------------------------------------------
# Pallas kernels
# -----------------------------------------------------------------------------
def _deconv_phase_kernel(w_ref, p_ref, shift_ref, o_ref):
    """relu((scale*W)_phase @ P_phase + shift) for the 4 sub-pixel phases.

    w_ref:     (4, Cout, 4*Cin)   bf16   BN scale folded in
    p_ref:     (4, 4*Cin, tile_m) bf16   phase im2col patches
    shift_ref: (Cout, 1)          f32    conv bias + BN shift folded
    o_ref:     (4, Cout, tile_m)  f32
    """
    s = shift_ref[...]                                   # (Cout, 1)
    for p in range(4):                                   # static unroll: 4 GEMMs, K = 4*Cin
        acc = jnp.dot(w_ref[p], p_ref[p], preferred_element_type=jnp.float32)
        o_ref[p] = jnp.maximum(acc + s, 0.0)


def _upsample_kernel(x_ref, awt_ref, ah_ref, o_ref, *, hi, nc):
    """Separable bilinear resize (align_corners=True).

    x_ref:   (nc*hi, Wi)        f32
    awt_ref: (Wi, pic_w)        f32
    ah_ref:  (pic_h, hi)        f32
    o_ref:   (nc, pic_h, pic_w) f32
    """
    t = jnp.dot(x_ref[...], awt_ref[...], preferred_element_type=jnp.float32)
    for c in range(nc):                                  # static unroll, nc = N*C small
        o_ref[c] = jnp.dot(ah_ref[...], t[c * hi:(c + 1) * hi, :],
                           preferred_element_type=jnp.float32)


# -----------------------------------------------------------------------------
# Wrapper-side layout plumbing (pure data movement, no FLOPs)
# -----------------------------------------------------------------------------
def _phase_im2col(x):
    """(N, C, H, W) -> (4, 4*C, N*H*W) phase-wise 4-tap im2col (no zero rows)."""
    N, C, H, W = x.shape
    xp = jnp.pad(x, ((0, 0), (0, 0), (1, 1), (1, 1)))

    def sh(dy, dx):  # element [m, n] = x[m+dy, n+dx] with zero padding
        return xp[:, :, 1 + dy:1 + dy + H, 1 + dx:1 + dx + W]

    phases = []
    for taps in PHASE_TAPS:
        t = jnp.stack([sh(dy, dx) for (_, _, dy, dx) in taps], axis=0)  # (4,N,C,H,W)
        phases.append(t.transpose(0, 2, 1, 3, 4).reshape(4 * C, N * H * W))
    return jnp.stack(phases, axis=0)


def _phase_weights(w, scale):
    """PyTorch ConvTranspose2d weight (Cin,Cout,4,4) -> (4, Cout, 4*Cin), BN scale folded."""
    cin, cout = w.shape[0], w.shape[1]
    mats = []
    for taps in PHASE_TAPS:
        wp = jnp.stack([w[:, :, ky, kx] for (ky, kx, _, _) in taps], axis=0)  # (4,Cin,Cout)
        mats.append(wp.transpose(2, 0, 1).reshape(cout, 4 * cin))
    return jnp.stack(mats, axis=0) * scale.reshape(1, cout, 1)


def _interp_matrix(out_size, in_size):
    """1-D bilinear interpolation matrix, align_corners=True."""
    if out_size == 1:
        src = np.zeros((1,), np.float64)
    else:
        src = np.arange(out_size, dtype=np.float64) * (in_size - 1) / (out_size - 1)
    i0 = np.clip(np.floor(src).astype(np.int64), 0, in_size - 1)
    i1 = np.minimum(i0 + 1, in_size - 1)
    f = (src - i0).astype(np.float32)
    A = np.zeros((out_size, in_size), np.float32)
    A[np.arange(out_size), i0] += 1.0 - f
    A[np.arange(out_size), i1] += f
    return A


def _pick_tile_m(m):
    """Lane-dense m tiles: >=128 lanes to stay unmasked, big enough to amortize
    the ~0.35us per-grid-step overhead, whole-m when the problem is tiny."""
    for t in (1024, 512, 256, 128):
        if m >= t and m % t == 0:
            return t
    return m


# -----------------------------------------------------------------------------
# DecoderDv forward with Pallas kernels
# -----------------------------------------------------------------------------
def _deconv_bn_relu_layer(h, w, b, gamma, beta, mean, var):
    N, _, H, W = h.shape
    cin, cout = w.shape[0], w.shape[1]
    m = N * H * W
    k4 = 4 * cin

    scale = gamma / jnp.sqrt(var + EPS)                          # BN scale (inference fold)
    shift = (beta + (b - mean) * scale).reshape(cout, 1).astype(jnp.float32)
    wph = _phase_weights(w, scale).astype(jnp.bfloat16)          # (4, cout, 4*cin)
    pph = _phase_im2col(h.astype(jnp.bfloat16))                  # (4, 4*cin, m)

    tile_m = _pick_tile_m(m)
    out = pl.pallas_call(
        _deconv_phase_kernel,
        out_shape=jax.ShapeDtypeStruct((4, cout, m), jnp.float32),
        grid=(m // tile_m,),
        in_specs=[
            pl.BlockSpec((4, cout, k4), lambda i: (0, 0, 0)),     # weights stay resident
            pl.BlockSpec((4, k4, tile_m), lambda i: (0, 0, i)),   # patches tiled over m
            pl.BlockSpec((cout, 1), lambda i: (0, 0)),
        ],
        out_specs=pl.BlockSpec((4, cout, tile_m), lambda i: (0, 0, i)),
        compiler_params=pltpu.CompilerParams(
            dimension_semantics=("parallel",),
            vmem_limit_bytes=32 * 1024 * 1024),
    )(wph, pph, shift)

    # Un-phase (pure layout): (py, px, co, n, h, w) -> (n, co, 2h+py, 2w+px).
    return (out.reshape(2, 2, cout, N, H, W)
               .transpose(3, 2, 4, 0, 5, 1)
               .reshape(N, cout, 2 * H, 2 * W))


def _bilinear_upsample(h, pic_h, pic_w):
    N, C, Hi, Wi = h.shape
    nc = N * C
    ah = jnp.asarray(_interp_matrix(pic_h, Hi))                  # (pic_h, Hi)
    awt = jnp.asarray(_interp_matrix(pic_w, Wi).T)               # (Wi, pic_w)
    kern = functools.partial(_upsample_kernel, hi=Hi, nc=nc)
    out = pl.pallas_call(
        kern,
        out_shape=jax.ShapeDtypeStruct((nc, pic_h, pic_w), jnp.float32),
        compiler_params=pltpu.CompilerParams(vmem_limit_bytes=32 * 1024 * 1024),
    )(h.reshape(nc * Hi, Wi), awt, ah)
    return out.reshape(N, C, pic_h, pic_w)


def decoder_dv_pallas(x, params, pic_h, pic_w):
    """x: (N, latent_dim, H, W); params: 3 tuples (w, b, gamma, beta, mean, var)."""
    h = x.astype(jnp.float32)
    for (w, b, gamma, beta, mean, var) in params:
        h = _deconv_bn_relu_layer(h, w, b, gamma, beta, mean, var)
    return _bilinear_upsample(h, pic_h, pic_w)


# -----------------------------------------------------------------------------
# Pure-JAX reference (independent code path) for correctness checking
# -----------------------------------------------------------------------------
def decoder_dv_ref(x, params, pic_h, pic_w):
    h = x.astype(jnp.float32)
    for (w, b, gamma, beta, mean, var) in params:
        wk = jnp.transpose(jnp.flip(w, axis=(2, 3)), (1, 0, 2, 3))  # (Cout,Cin,4,4)
        h = lax.conv_general_dilated(
            h, wk, window_strides=(1, 1), padding=[(2, 2), (2, 2)],
            lhs_dilation=(2, 2), dimension_numbers=("NCHW", "OIHW", "NCHW"),
            precision=lax.Precision.HIGHEST)
        h = h + b.reshape(1, -1, 1, 1)
        h = ((h - mean.reshape(1, -1, 1, 1))
             * (gamma.reshape(1, -1, 1, 1) / jnp.sqrt(var.reshape(1, -1, 1, 1) + EPS))
             + beta.reshape(1, -1, 1, 1))
        h = jnp.maximum(h, 0.0)

    # bilinear upsample, align_corners=True
    N, C, H, W = h.shape
    ys = jnp.linspace(0.0, H - 1.0, pic_h) if pic_h > 1 else jnp.zeros((1,))
    xs = jnp.linspace(0.0, W - 1.0, pic_w) if pic_w > 1 else jnp.zeros((1,))
    y0 = jnp.clip(jnp.floor(ys), 0, H - 1).astype(jnp.int32)
    x0 = jnp.clip(jnp.floor(xs), 0, W - 1).astype(jnp.int32)
    y1 = jnp.minimum(y0 + 1, H - 1)
    x1 = jnp.minimum(x0 + 1, W - 1)
    fy = (ys - y0.astype(ys.dtype)).reshape(1, 1, pic_h, 1)
    fx = (xs - x0.astype(xs.dtype)).reshape(1, 1, 1, pic_w)
    g = lambda yi, xi: h[:, :, yi, :][:, :, :, xi]
    top = g(y0, x0) * (1.0 - fx) + g(y0, x1) * fx
    bot = g(y1, x0) * (1.0 - fx) + g(y1, x1) * fx
    return top * (1.0 - fy) + bot * fy


if __name__ == "__main__":
    key = jax.random.PRNGKey(0)
    latent_dim, output_dim = 8, 3
    N, H0, W0 = 2, 4, 4         # deconv stack: 4x4 -> 8x8 -> 16x16 -> 32x32
    pic_h, pic_w = 40, 40       # final bilinear upsample target

    keys = jax.random.split(key, 4)
    x = jax.random.normal(keys[0], (N, latent_dim, H0, W0), jnp.float32)

    def make_layer(cin, cout, ks):
        kw, kb, kg, kbe, km, kv = jax.random.split(ks, 6)
        bound = 1.0 / np.sqrt(cin * 16)
        w = jax.random.uniform(kw, (cin, cout, 4, 4), jnp.float32, -bound, bound)
        b = jax.random.uniform(kb, (cout,), jnp.float32, -bound, bound)
        gamma = jax.random.uniform(kg, (cout,), jnp.float32, 0.8, 1.2)
        beta = jax.random.uniform(kbe, (cout,), jnp.float32, -0.1, 0.1)
        mean = jax.random.uniform(km, (cout,), jnp.float32, -0.1, 0.1)
        var = jax.random.uniform(kv, (cout,), jnp.float32, 0.8, 1.2)
        return (w, b, gamma, beta, mean, var)

    params = [make_layer(latent_dim, 64, keys[1]),
              make_layer(64, 32, keys[2]),
              make_layer(32, output_dim, keys[3])]

    fwd = jax.jit(functools.partial(decoder_dv_pallas, pic_h=pic_h, pic_w=pic_w))
    out = jax.block_until_ready(fwd(x, params))
    assert out.shape == (N, output_dim, pic_h, pic_w)

    ref = decoder_dv_ref(x, params, pic_h, pic_w)
    # bf16 MXU operands (f32 accumulation) -> looser tolerance than the f32 path.
    np.testing.assert_allclose(np.asarray(out), np.asarray(ref),
                               rtol=1e-2, atol=1e-2)

    print("KERNEL_OK")
</pallas_src>

<mosaic_0001>
module attributes {stable_mosaic.version = 11 : i64} {
  func.func @_deconv_phase_kernel(%arg0: i32, %arg1: memref<4x64x32xbf16, #tpu.memory_space<vmem>>, %arg2: memref<4x32x32xbf16, #tpu.memory_space<vmem>>, %arg3: memref<64x1xf32, #tpu.memory_space<vmem>>, %arg4: memref<4x64x32xf32, #tpu.memory_space<vmem>>) attributes {dimension_semantics = [#tpu.dimension_semantics<parallel>], iteration_bounds = array<i64: 1>, scalar_prefetch = 0 : i64, scratch_operands = 0 : i64, tpu.core_type = #tpu.core_type<tc>, window_params = [{pipeline_mode = #tpu.pipeline_mode<synchronous>, transform_indices = @transform_0, window_bounds = array<i64: 4, 64, 32>}, {transform_indices = @transform_1, window_bounds = array<i64: 4, 32, 32>}, {pipeline_mode = #tpu.pipeline_mode<synchronous>, transform_indices = @transform_2, window_bounds = array<i64: 64, 1>}, {transform_indices = @transform_3, window_bounds = array<i64: 4, 64, 32>}]} {
    %c0 = arith.constant 0 : index
    %c0_0 = arith.constant 0 : index
    %0 = vector.load %arg3[%c0, %c0_0] : memref<64x1xf32, #tpu.memory_space<vmem>>, vector<64x1xf32>
    %c0_1 = arith.constant 0 : index
    %c0_2 = arith.constant 0 : index
    %c0_3 = arith.constant 0 : index
    %1 = vector.load %arg1[%c0_1, %c0_2, %c0_3] : memref<4x64x32xbf16, #tpu.memory_space<vmem>>, vector<1x64x32xbf16>
    %2 = vector.shape_cast %1 : vector<1x64x32xbf16> to vector<64x32xbf16>
    %c0_4 = arith.constant 0 : index
    %c0_5 = arith.constant 0 : index
    %c0_6 = arith.constant 0 : index
    %3 = vector.load %arg2[%c0_4, %c0_5, %c0_6] : memref<4x32x32xbf16, #tpu.memory_space<vmem>>, vector<1x32x32xbf16>
    %4 = vector.shape_cast %3 : vector<1x32x32xbf16> to vector<32x32xbf16>
    %cst = arith.constant dense<0.000000e+00> : vector<64x32xf32>
    %5 = tpu.matmul %2, %4, %cst {dimension_numbers = #tpu.dot_dimension_numbers<[1], [0], [0], [1], [0, 0, 1, 1], [], []>} : vector<64x32xbf16>, vector<32x32xbf16>, vector<64x32xf32> -> vector<64x32xf32>
    %6 = vector.broadcast %0 : vector<64x1xf32> to vector<64x32xf32>
    %7 = arith.addf %5, %6 : vector<64x32xf32>
    %cst_7 = arith.constant 0.000000e+00 : f32
    %8 = vector.broadcast %cst_7 : f32 to vector<64x32xf32>
    %9 = arith.maximumf %7, %8 : vector<64x32xf32>
    %c0_8 = arith.constant 0 : index
    %c0_9 = arith.constant 0 : index
    %c0_10 = arith.constant 0 : index
    %10 = vector.load %arg4[%c0_8, %c0_9, %c0_10] : memref<4x64x32xf32, #tpu.memory_space<vmem>>, vector<1x64x32xf32>
    %11 = vector.shape_cast %10 : vector<1x64x32xf32> to vector<64x32xf32>
    %12 = vector.shape_cast %9 : vector<64x32xf32> to vector<1x64x32xf32>
    tpu.vector_store %arg4[%c0_8, %c0_9, %c0_10], %12 {strides = array<i32>} : memref<4x64x32xf32, #tpu.memory_space<vmem>>, vector<1x64x32xf32>,
    %c1 = arith.constant 1 : index
    %c0_11 = arith.constant 0 : index
    %c0_12 = arith.constant 0 : index
    %13 = vector.load %arg1[%c1, %c0_11, %c0_12] : memref<4x64x32xbf16, #tpu.memory_space<vmem>>, vector<1x64x32xbf16>
    %14 = vector.shape_cast %13 : vector<1x64x32xbf16> to vector<64x32xbf16>
    %c1_13 = arith.constant 1 : index
    %c0_14 = arith.constant 0 : index
    %c0_15 = arith.constant 0 : index
    %15 = vector.load %arg2[%c1_13, %c0_14, %c0_15] : memref<4x32x32xbf16, #tpu.memory_space<vmem>>, vector<1x32x32xbf16>
    %16 = vector.shape_cast %15 : vector<1x32x32xbf16> to vector<32x32xbf16>
    %cst_16 = arith.constant dense<0.000000e+00> : vector<64x32xf32>
    %17 = tpu.matmul %14, %16, %cst_16 {dimension_numbers = #tpu.dot_dimension_numbers<[1], [0], [0], [1], [0, 0, 1, 1], [], []>} : vector<64x32xbf16>, vector<32x32xbf16>, vector<64x32xf32> -> vector<64x32xf32>
    %18 = vector.broadcast %0 : vector<64x1xf32> to vector<64x32xf32>
    %19 = arith.addf %17, %18 : vector<64x32xf32>
    %cst_17 = arith.constant 0.000000e+00 : f32
    %20 = vector.broadcast %cst_17 : f32 to vector<64x32xf32>
    %21 = arith.maximumf %19, %20 : vector<64x32xf32>
    %c1_18 = arith.constant 1 : index
    %c0_19 = arith.constant 0 : index
    %c0_20 = arith.constant 0 : index
    %22 = vector.load %arg4[%c1_18, %c0_19, %c0_20] : memref<4x64x32xf32, #tpu.memory_space<vmem>>, vector<1x64x32xf32>
    %23 = vector.shape_cast %22 : vector<1x64x32xf32> to vector<64x32xf32>
    %24 = vector.shape_cast %21 : vector<64x32xf32> to vector<1x64x32xf32>
    tpu.vector_store %arg4[%c1_18, %c0_19, %c0_20], %24 {strides = array<i32>} : memref<4x64x32xf32, #tpu.memory_space<vmem>>, vector<1x64x32xf32>,
    %c2 = arith.constant 2 : index
    %c0_21 = arith.constant 0 : index
    %c0_22 = arith.constant 0 : index
    %25 = vector.load %arg1[%c2, %c0_21, %c0_22] : memref<4x64x32xbf16, #tpu.memory_space<vmem>>, vector<1x64x32xbf16>
    %26 = vector.shape_cast %25 : vector<1x64x32xbf16> to vector<64x32xbf16>
    %c2_23 = arith.constant 2 : index
    %c0_24 = arith.constant 0 : index
    %c0_25 = arith.constant 0 : index
    %27 = vector.load %arg2[%c2_23, %c0_24, %c0_25] : memref<4x32x32xbf16, #tpu.memory_space<vmem>>, vector<1x32x32xbf16>
    %28 = vector.shape_cast %27 : vector<1x32x32xbf16> to vector<32x32xbf16>
    %cst_26 = arith.constant dense<0.000000e+00> : vector<64x32xf32>
    %29 = tpu.matmul %26, %28, %cst_26 {dimension_numbers = #tpu.dot_dimension_numbers<[1], [0], [0], [1], [0, 0, 1, 1], [], []>} : vector<64x32xbf16>, vector<32x32xbf16>, vector<64x32xf32> -> vector<64x32xf32>
    %30 = vector.broadcast %0 : vector<64x1xf32> to vector<64x32xf32>
    %31 = arith.addf %29, %30 : vector<64x32xf32>
    %cst_27 = arith.constant 0.000000e+00 : f32
    %32 = vector.broadcast %cst_27 : f32 to vector<64x32xf32>
    %33 = arith.maximumf %31, %32 : vector<64x32xf32>
    %c2_28 = arith.constant 2 : index
    %c0_29 = arith.constant 0 : index
    %c0_30 = arith.constant 0 : index
    %34 = vector.load %arg4[%c2_28, %c0_29, %c0_30] : memref<4x64x32xf32, #tpu.memory_space<vmem>>, vector<1x64x32xf32>
    %35 = vector.shape_cast %34 : vector<1x64x32xf32> to vector<64x32xf32>
    %36 = vector.shape_cast %33 : vector<64x32xf32> to vector<1x64x32xf32>
    tpu.vector_store %arg4[%c2_28, %c0_29, %c0_30], %36 {strides = array<i32>} : memref<4x64x32xf32, #tpu.memory_space<vmem>>, vector<1x64x32xf32>,
    %c3 = arith.constant 3 : index
    %c0_31 = arith.constant 0 : index
    %c0_32 = arith.constant 0 : index
    %37 = vector.load %arg1[%c3, %c0_31, %c0_32] : memref<4x64x32xbf16, #tpu.memory_space<vmem>>, vector<1x64x32xbf16>
    %38 = vector.shape_cast %37 : vector<1x64x32xbf16> to vector<64x32xbf16>
    %c3_33 = arith.constant 3 : index
    %c0_34 = arith.constant 0 : index
    %c0_35 = arith.constant 0 : index
    %39 = vector.load %arg2[%c3_33, %c0_34, %c0_35] : memref<4x32x32xbf16, #tpu.memory_space<vmem>>, vector<1x32x32xbf16>
    %40 = vector.shape_cast %39 : vector<1x32x32xbf16> to vector<32x32xbf16>
    %cst_36 = arith.constant dense<0.000000e+00> : vector<64x32xf32>
    %41 = tpu.matmul %38, %40, %cst_36 {dimension_numbers = #tpu.dot_dimension_numbers<[1], [0], [0], [1], [0, 0, 1, 1], [], []>} : vector<64x32xbf16>, vector<32x32xbf16>, vector<64x32xf32> -> vector<64x32xf32>
    %42 = vector.broadcast %0 : vector<64x1xf32> to vector<64x32xf32>
    %43 = arith.addf %41, %42 : vector<64x32xf32>
    %cst_37 = arith.constant 0.000000e+00 : f32
    %44 = vector.broadcast %cst_37 : f32 to vector<64x32xf32>
    %45 = arith.maximumf %43, %44 : vector<64x32xf32>
    %c3_38 = arith.constant 3 : index
    %c0_39 = arith.constant 0 : index
    %c0_40 = arith.constant 0 : index
    %46 = vector.load %arg4[%c3_38, %c0_39, %c0_40] : memref<4x64x32xf32, #tpu.memory_space<vmem>>, vector<1x64x32xf32>
    %47 = vector.shape_cast %46 : vector<1x64x32xf32> to vector<64x32xf32>
    %48 = vector.shape_cast %45 : vector<64x32xf32> to vector<1x64x32xf32>
    tpu.vector_store %arg4[%c3_38, %c0_39, %c0_40], %48 {strides = array<i32>} : memref<4x64x32xf32, #tpu.memory_space<vmem>>, vector<1x64x32xf32>,
    return
  }
  func.func @transform_0(%arg0: i32) -> (i32, i32, i32) {
    %c0_i32 = arith.constant 0 : i32
    %c0_i32_0 = arith.constant 0 : i32
    %c0_i32_1 = arith.constant 0 : i32
    %c0_i32_2 = arith.constant 0 : i32
    return %c0_i32, %c0_i32_0, %c0_i32_1 : i32, i32, i32
  }
  func.func @transform_1(%arg0: i32) -> (i32, i32, i32) {
    %c0_i32 = arith.constant 0 : i32
    %c0_i32_0 = arith.constant 0 : i32
    %c0_i32_1 = arith.constant 0 : i32
    return %c0_i32, %c0_i32_0, %arg0 : i32, i32, i32
  }
  func.func @transform_2(%arg0: i32) -> (i32, i32) {
    %c0_i32 = arith.constant 0 : i32
    %c0_i32_0 = arith.constant 0 : i32
    %c0_i32_1 = arith.constant 0 : i32
    return %c0_i32, %c0_i32_0 : i32, i32
  }
  func.func @transform_3(%arg0: i32) -> (i32, i32, i32) {
    %c0_i32 = arith.constant 0 : i32
    %c0_i32_0 = arith.constant 0 : i32
    %c0_i32_1 = arith.constant 0 : i32
    return %c0_i32, %c0_i32_0, %arg0 : i32, i32, i32
  }
}

module attributes {stable_mosaic.version = 11 : i64} {
  func.func @_deconv_phase_kernel(%arg0: i32, %arg1: memref<4x32x256xbf16, #tpu.memory_space<vmem>>, %arg2: memref<4x256x128xbf16, #tpu.memory_space<vmem>>, %arg3: memref<32x1xf32, #tpu.memory_space<vmem>>, %arg4: memref<4x32x128xf32, #tpu.memory_space<vmem>>) attributes {dimension_semantics = [#tpu.dimension_semantics<parallel>], iteration_bounds = array<i64: 1>, scalar_prefetch = 0 : i64, scratch_operands = 0 : i64, tpu.core_type = #tpu.core_type<tc>, window_params = [{pipeline_mode = #tpu.pipeline_mode<synchronous>, transform_indices = @transform_0, window_bounds = array<i64: 4, 32, 256>}, {transform_indices = @transform_1, window_bounds = array<i64: 4, 256, 128>}, {pipeline_mode = #tpu.pipeline_mode<synchronous>, transform_indices = @transform_2, window_bounds = array<i64: 32, 1>}, {transform_indices = @transform_3, window_bounds = array<i64: 4, 32, 128>}]} {
    %c0 = arith.constant 0 : index
    %c0_0 = arith.constant 0 : index
    %0 = vector.load %arg3[%c0, %c0_0] : memref<32x1xf32, #tpu.memory_space<vmem>>, vector<32x1xf32>
    %c0_1 = arith.constant 0 : index
    %c0_2 = arith.constant 0 : index
    %c0_3 = arith.constant 0 : index
    %1 = vector.load %arg1[%c0_1, %c0_2, %c0_3] : memref<4x32x256xbf16, #tpu.memory_space<vmem>>, vector<1x32x256xbf16>
    %2 = vector.shape_cast %1 : vector<1x32x256xbf16> to vector<32x256xbf16>
    %c0_4 = arith.constant 0 : index
    %c0_5 = arith.constant 0 : index
    %c0_6 = arith.constant 0 : index
    %3 = vector.load %arg2[%c0_4, %c0_5, %c0_6] : memref<4x256x128xbf16, #tpu.memory_space<vmem>>, vector<1x256x128xbf16>
    %4 = vector.shape_cast %3 : vector<1x256x128xbf16> to vector<256x128xbf16>
    %cst = arith.constant dense<0.000000e+00> : vector<32x128xf32>
    %5 = tpu.matmul %2, %4, %cst {dimension_numbers = #tpu.dot_dimension_numbers<[1], [0], [0], [1], [0, 0, 1, 1], [], []>} : vector<32x256xbf16>, vector<256x128xbf16>, vector<32x128xf32> -> vector<32x128xf32>
    %6 = vector.broadcast %0 : vector<32x1xf32> to vector<32x128xf32>
    %7 = arith.addf %5, %6 : vector<32x128xf32>
    %cst_7 = arith.constant 0.000000e+00 : f32
    %8 = vector.broadcast %cst_7 : f32 to vector<32x128xf32>
    %9 = arith.maximumf %7, %8 : vector<32x128xf32>
    %c0_8 = arith.constant 0 : index
    %c0_9 = arith.constant 0 : index
    %c0_10 = arith.constant 0 : index
    %10 = vector.load %arg4[%c0_8, %c0_9, %c0_10] : memref<4x32x128xf32, #tpu.memory_space<vmem>>, vector<1x32x128xf32>
    %11 = vector.shape_cast %10 : vector<1x32x128xf32> to vector<32x128xf32>
    %12 = vector.shape_cast %9 : vector<32x128xf32> to vector<1x32x128xf32>
    tpu.vector_store %arg4[%c0_8, %c0_9, %c0_10], %12 {strides = array<i32>} : memref<4x32x128xf32, #tpu.memory_space<vmem>>, vector<1x32x128xf32>,
    %c1 = arith.constant 1 : index
    %c0_11 = arith.constant 0 : index
    %c0_12 = arith.constant 0 : index
    %13 = vector.load %arg1[%c1, %c0_11, %c0_12] : memref<4x32x256xbf16, #tpu.memory_space<vmem>>, vector<1x32x256xbf16>
    %14 = vector.shape_cast %13 : vector<1x32x256xbf16> to vector<32x256xbf16>
    %c1_13 = arith.constant 1 : index
    %c0_14 = arith.constant 0 : index
    %c0_15 = arith.constant 0 : index
    %15 = vector.load %arg2[%c1_13, %c0_14, %c0_15] : memref<4x256x128xbf16, #tpu.memory_space<vmem>>, vector<1x256x128xbf16>
    %16 = vector.shape_cast %15 : vector<1x256x128xbf16> to vector<256x128xbf16>
    %cst_16 = arith.constant dense<0.000000e+00> : vector<32x128xf32>
    %17 = tpu.matmul %14, %16, %cst_16 {dimension_numbers = #tpu.dot_dimension_numbers<[1], [0], [0], [1], [0, 0, 1, 1], [], []>} : vector<32x256xbf16>, vector<256x128xbf16>, vector<32x128xf32> -> vector<32x128xf32>
    %18 = vector.broadcast %0 : vector<32x1xf32> to vector<32x128xf32>
    %19 = arith.addf %17, %18 : vector<32x128xf32>
    %cst_17 = arith.constant 0.000000e+00 : f32
    %20 = vector.broadcast %cst_17 : f32 to vector<32x128xf32>
    %21 = arith.maximumf %19, %20 : vector<32x128xf32>
    %c1_18 = arith.constant 1 : index
    %c0_19 = arith.constant 0 : index
    %c0_20 = arith.constant 0 : index
    %22 = vector.load %arg4[%c1_18, %c0_19, %c0_20] : memref<4x32x128xf32, #tpu.memory_space<vmem>>, vector<1x32x128xf32>
    %23 = vector.shape_cast %22 : vector<1x32x128xf32> to vector<32x128xf32>
    %24 = vector.shape_cast %21 : vector<32x128xf32> to vector<1x32x128xf32>
    tpu.vector_store %arg4[%c1_18, %c0_19, %c0_20], %24 {strides = array<i32>} : memref<4x32x128xf32, #tpu.memory_space<vmem>>, vector<1x32x128xf32>,
    %c2 = arith.constant 2 : index
    %c0_21 = arith.constant 0 : index
    %c0_22 = arith.constant 0 : index
    %25 = vector.load %arg1[%c2, %c0_21, %c0_22] : memref<4x32x256xbf16, #tpu.memory_space<vmem>>, vector<1x32x256xbf16>
    %26 = vector.shape_cast %25 : vector<1x32x256xbf16> to vector<32x256xbf16>
    %c2_23 = arith.constant 2 : index
    %c0_24 = arith.constant 0 : index
    %c0_25 = arith.constant 0 : index
    %27 = vector.load %arg2[%c2_23, %c0_24, %c0_25] : memref<4x256x128xbf16, #tpu.memory_space<vmem>>, vector<1x256x128xbf16>
    %28 = vector.shape_cast %27 : vector<1x256x128xbf16> to vector<256x128xbf16>
    %cst_26 = arith.constant dense<0.000000e+00> : vector<32x128xf32>
    %29 = tpu.matmul %26, %28, %cst_26 {dimension_numbers = #tpu.dot_dimension_numbers<[1], [0], [0], [1], [0, 0, 1, 1], [], []>} : vector<32x256xbf16>, vector<256x128xbf16>, vector<32x128xf32> -> vector<32x128xf32>
    %30 = vector.broadcast %0 : vector<32x1xf32> to vector<32x128xf32>
    %31 = arith.addf %29, %30 : vector<32x128xf32>
    %cst_27 = arith.constant 0.000000e+00 : f32
    %32 = vector.broadcast %cst_27 : f32 to vector<32x128xf32>
    %33 = arith.maximumf %31, %32 : vector<32x128xf32>
    %c2_28 = arith.constant 2 : index
    %c0_29 = arith.constant 0 : index
    %c0_30 = arith.constant 0 : index
    %34 = vector.load %arg4[%c2_28, %c0_29, %c0_30] : memref<4x32x128xf32, #tpu.memory_space<vmem>>, vector<1x32x128xf32>
    %35 = vector.shape_cast %34 : vector<1x32x128xf32> to vector<32x128xf32>
    %36 = vector.shape_cast %33 : vector<32x128xf32> to vector<1x32x128xf32>
    tpu.vector_store %arg4[%c2_28, %c0_29, %c0_30], %36 {strides = array<i32>} : memref<4x32x128xf32, #tpu.memory_space<vmem>>, vector<1x32x128xf32>,
    %c3 = arith.constant 3 : index
    %c0_31 = arith.constant 0 : index
    %c0_32 = arith.constant 0 : index
    %37 = vector.load %arg1[%c3, %c0_31, %c0_32] : memref<4x32x256xbf16, #tpu.memory_space<vmem>>, vector<1x32x256xbf16>
    %38 = vector.shape_cast %37 : vector<1x32x256xbf16> to vector<32x256xbf16>
    %c3_33 = arith.constant 3 : index
    %c0_34 = arith.constant 0 : index
    %c0_35 = arith.constant 0 : index
    %39 = vector.load %arg2[%c3_33, %c0_34, %c0_35] : memref<4x256x128xbf16, #tpu.memory_space<vmem>>, vector<1x256x128xbf16>
    %40 = vector.shape_cast %39 : vector<1x256x128xbf16> to vector<256x128xbf16>
    %cst_36 = arith.constant dense<0.000000e+00> : vector<32x128xf32>
    %41 = tpu.matmul %38, %40, %cst_36 {dimension_numbers = #tpu.dot_dimension_numbers<[1], [0], [0], [1], [0, 0, 1, 1], [], []>} : vector<32x256xbf16>, vector<256x128xbf16>, vector<32x128xf32> -> vector<32x128xf32>
    %42 = vector.broadcast %0 : vector<32x1xf32> to vector<32x128xf32>
    %43 = arith.addf %41, %42 : vector<32x128xf32>
    %cst_37 = arith.constant 0.000000e+00 : f32
    %44 = vector.broadcast %cst_37 : f32 to vector<32x128xf32>
    %45 = arith.maximumf %43, %44 : vector<32x128xf32>
    %c3_38 = arith.constant 3 : index
    %c0_39 = arith.constant 0 : index
    %c0_40 = arith.constant 0 : index
    %46 = vector.load %arg4[%c3_38, %c0_39, %c0_40] : memref<4x32x128xf32, #tpu.memory_space<vmem>>, vector<1x32x128xf32>
    %47 = vector.shape_cast %46 : vector<1x32x128xf32> to vector<32x128xf32>
    %48 = vector.shape_cast %45 : vector<32x128xf32> to vector<1x32x128xf32>
    tpu.vector_store %arg4[%c3_38, %c0_39, %c0_40], %48 {strides = array<i32>} : memref<4x32x128xf32, #tpu.memory_space<vmem>>, vector<1x32x128xf32>,
    return
  }
  func.func @transform_0(%arg0: i32) -> (i32, i32, i32) {
    %c0_i32 = arith.constant 0 : i32
    %c0_i32_0 = arith.constant 0 : i32
    %c0_i32_1 = arith.constant 0 : i32
    %c0_i32_2 = arith.constant 0 : i32
    return %c0_i32, %c0_i32_0, %c0_i32_1 : i32, i32, i32
  }
  func.func @transform_1(%arg0: i32) -> (i32, i32, i32) {
    %c0_i32 = arith.constant 0 : i32
    %c0_i32_0 = arith.constant 0 : i32
    %c0_i32_1 = arith.constant 0 : i32
    return %c0_i32, %c0_i32_0, %arg0 : i32, i32, i32
  }
  func.func @transform_2(%arg0: i32) -> (i32, i32) {
    %c0_i32 = arith.constant 0 : i32
    %c0_i32_0 = arith.constant 0 : i32
    %c0_i32_1 = arith.constant 0 : i32
    return %c0_i32, %c0_i32_0 : i32, i32
  }
  func.func @transform_3(%arg0: i32) -> (i32, i32, i32) {
    %c0_i32 = arith.constant 0 : i32
    %c0_i32_0 = arith.constant 0 : i32
    %c0_i32_1 = arith.constant 0 : i32
    return %c0_i32, %c0_i32_0, %arg0 : i32, i32, i32
  }
}

module attributes {stable_mosaic.version = 11 : i64} {
  func.func @_deconv_phase_kernel(%arg0: i32, %arg1: memref<4x3x128xbf16, #tpu.memory_space<vmem>>, %arg2: memref<4x128x512xbf16, #tpu.memory_space<vmem>>, %arg3: memref<3x1xf32, #tpu.memory_space<vmem>>, %arg4: memref<4x3x512xf32, #tpu.memory_space<vmem>>) attributes {dimension_semantics = [#tpu.dimension_semantics<parallel>], iteration_bounds = array<i64: 1>, scalar_prefetch = 0 : i64, scratch_operands = 0 : i64, tpu.core_type = #tpu.core_type<tc>, window_params = [{pipeline_mode = #tpu.pipeline_mode<synchronous>, transform_indices = @transform_0, window_bounds = array<i64: 4, 3, 128>}, {transform_indices = @transform_1, window_bounds = array<i64: 4, 128, 512>}, {pipeline_mode = #tpu.pipeline_mode<synchronous>, transform_indices = @transform_2, window_bounds = array<i64: 3, 1>}, {transform_indices = @transform_3, window_bounds = array<i64: 4, 3, 512>}]} {
    %c0 = arith.constant 0 : index
    %c0_0 = arith.constant 0 : index
    %0 = vector.load %arg3[%c0, %c0_0] : memref<3x1xf32, #tpu.memory_space<vmem>>, vector<3x1xf32>
    %c0_1 = arith.constant 0 : index
    %c0_2 = arith.constant 0 : index
    %c0_3 = arith.constant 0 : index
    %1 = vector.load %arg1[%c0_1, %c0_2, %c0_3] : memref<4x3x128xbf16, #tpu.memory_space<vmem>>, vector<1x3x128xbf16>
    %2 = vector.shape_cast %1 : vector<1x3x128xbf16> to vector<3x128xbf16>
    %c0_4 = arith.constant 0 : index
    %c0_5 = arith.constant 0 : index
    %c0_6 = arith.constant 0 : index
    %3 = vector.load %arg2[%c0_4, %c0_5, %c0_6] : memref<4x128x512xbf16, #tpu.memory_space<vmem>>, vector<1x128x512xbf16>
    %4 = vector.shape_cast %3 : vector<1x128x512xbf16> to vector<128x512xbf16>
    %cst = arith.constant dense<0.000000e+00> : vector<3x512xf32>
    %5 = tpu.matmul %2, %4, %cst {dimension_numbers = #tpu.dot_dimension_numbers<[1], [0], [0], [1], [0, 0, 1, 1], [], []>} : vector<3x128xbf16>, vector<128x512xbf16>, vector<3x512xf32> -> vector<3x512xf32>
    %6 = vector.broadcast %0 : vector<3x1xf32> to vector<3x512xf32>
    %7 = arith.addf %5, %6 : vector<3x512xf32>
    %cst_7 = arith.constant 0.000000e+00 : f32
    %8 = vector.broadcast %cst_7 : f32 to vector<3x512xf32>
    %9 = arith.maximumf %7, %8 : vector<3x512xf32>
    %c0_8 = arith.constant 0 : index
    %c0_9 = arith.constant 0 : index
    %c0_10 = arith.constant 0 : index
    %10 = vector.load %arg4[%c0_8, %c0_9, %c0_10] : memref<4x3x512xf32, #tpu.memory_space<vmem>>, vector<1x3x512xf32>
    %11 = vector.shape_cast %10 : vector<1x3x512xf32> to vector<3x512xf32>
    %12 = vector.shape_cast %9 : vector<3x512xf32> to vector<1x3x512xf32>
    tpu.vector_store %arg4[%c0_8, %c0_9, %c0_10], %12 {strides = array<i32>} : memref<4x3x512xf32, #tpu.memory_space<vmem>>, vector<1x3x512xf32>,
    %c1 = arith.constant 1 : index
    %c0_11 = arith.constant 0 : index
    %c0_12 = arith.constant 0 : index
    %13 = vector.load %arg1[%c1, %c0_11, %c0_12] : memref<4x3x128xbf16, #tpu.memory_space<vmem>>, vector<1x3x128xbf16>
    %14 = vector.shape_cast %13 : vector<1x3x128xbf16> to vector<3x128xbf16>
    %c1_13 = arith.constant 1 : index
    %c0_14 = arith.constant 0 : index
    %c0_15 = arith.constant 0 : index
    %15 = vector.load %arg2[%c1_13, %c0_14, %c0_15] : memref<4x128x512xbf16, #tpu.memory_space<vmem>>, vector<1x128x512xbf16>
    %16 = vector.shape_cast %15 : vector<1x128x512xbf16> to vector<128x512xbf16>
    %cst_16 = arith.constant dense<0.000000e+00> : vector<3x512xf32>
    %17 = tpu.matmul %14, %16, %cst_16 {dimension_numbers = #tpu.dot_dimension_numbers<[1], [0], [0], [1], [0, 0, 1, 1], [], []>} : vector<3x128xbf16>, vector<128x512xbf16>, vector<3x512xf32> -> vector<3x512xf32>
    %18 = vector.broadcast %0 : vector<3x1xf32> to vector<3x512xf32>
    %19 = arith.addf %17, %18 : vector<3x512xf32>
    %cst_17 = arith.constant 0.000000e+00 : f32
    %20 = vector.broadcast %cst_17 : f32 to vector<3x512xf32>
    %21 = arith.maximumf %19, %20 : vector<3x512xf32>
    %c1_18 = arith.constant 1 : index
    %c0_19 = arith.constant 0 : index
    %c0_20 = arith.constant 0 : index
    %22 = vector.load %arg4[%c1_18, %c0_19, %c0_20] : memref<4x3x512xf32, #tpu.memory_space<vmem>>, vector<1x3x512xf32>
    %23 = vector.shape_cast %22 : vector<1x3x512xf32> to vector<3x512xf32>
    %24 = vector.shape_cast %21 : vector<3x512xf32> to vector<1x3x512xf32>
    tpu.vector_store %arg4[%c1_18, %c0_19, %c0_20], %24 {strides = array<i32>} : memref<4x3x512xf32, #tpu.memory_space<vmem>>, vector<1x3x512xf32>,
    %c2 = arith.constant 2 : index
    %c0_21 = arith.constant 0 : index
    %c0_22 = arith.constant 0 : index
    %25 = vector.load %arg1[%c2, %c0_21, %c0_22] : memref<4x3x128xbf16, #tpu.memory_space<vmem>>, vector<1x3x128xbf16>
    %26 = vector.shape_cast %25 : vector<1x3x128xbf16> to vector<3x128xbf16>
    %c2_23 = arith.constant 2 : index
    %c0_24 = arith.constant 0 : index
    %c0_25 = arith.constant 0 : index
    %27 = vector.load %arg2[%c2_23, %c0_24, %c0_25] : memref<4x128x512xbf16, #tpu.memory_space<vmem>>, vector<1x128x512xbf16>
    %28 = vector.shape_cast %27 : vector<1x128x512xbf16> to vector<128x512xbf16>
    %cst_26 = arith.constant dense<0.000000e+00> : vector<3x512xf32>
    %29 = tpu.matmul %26, %28, %cst_26 {dimension_numbers = #tpu.dot_dimension_numbers<[1], [0], [0], [1], [0, 0, 1, 1], [], []>} : vector<3x128xbf16>, vector<128x512xbf16>, vector<3x512xf32> -> vector<3x512xf32>
    %30 = vector.broadcast %0 : vector<3x1xf32> to vector<3x512xf32>
    %31 = arith.addf %29, %30 : vector<3x512xf32>
    %cst_27 = arith.constant 0.000000e+00 : f32
    %32 = vector.broadcast %cst_27 : f32 to vector<3x512xf32>
    %33 = arith.maximumf %31, %32 : vector<3x512xf32>
    %c2_28 = arith.constant 2 : index
    %c0_29 = arith.constant 0 : index
    %c0_30 = arith.constant 0 : index
    %34 = vector.load %arg4[%c2_28, %c0_29, %c0_30] : memref<4x3x512xf32, #tpu.memory_space<vmem>>, vector<1x3x512xf32>
    %35 = vector.shape_cast %34 : vector<1x3x512xf32> to vector<3x512xf32>
    %36 = vector.shape_cast %33 : vector<3x512xf32> to vector<1x3x512xf32>
    tpu.vector_store %arg4[%c2_28, %c0_29, %c0_30], %36 {strides = array<i32>} : memref<4x3x512xf32, #tpu.memory_space<vmem>>, vector<1x3x512xf32>,
    %c3 = arith.constant 3 : index
    %c0_31 = arith.constant 0 : index
    %c0_32 = arith.constant 0 : index
    %37 = vector.load %arg1[%c3, %c0_31, %c0_32] : memref<4x3x128xbf16, #tpu.memory_space<vmem>>, vector<1x3x128xbf16>
    %38 = vector.shape_cast %37 : vector<1x3x128xbf16> to vector<3x128xbf16>
    %c3_33 = arith.constant 3 : index
    %c0_34 = arith.constant 0 : index
    %c0_35 = arith.constant 0 : index
    %39 = vector.load %arg2[%c3_33, %c0_34, %c0_35] : memref<4x128x512xbf16, #tpu.memory_space<vmem>>, vector<1x128x512xbf16>
    %40 = vector.shape_cast %39 : vector<1x128x512xbf16> to vector<128x512xbf16>
    %cst_36 = arith.constant dense<0.000000e+00> : vector<3x512xf32>
    %41 = tpu.matmul %38, %40, %cst_36 {dimension_numbers = #tpu.dot_dimension_numbers<[1], [0], [0], [1], [0, 0, 1, 1], [], []>} : vector<3x128xbf16>, vector<128x512xbf16>, vector<3x512xf32> -> vector<3x512xf32>
    %42 = vector.broadcast %0 : vector<3x1xf32> to vector<3x512xf32>
    %43 = arith.addf %41, %42 : vector<3x512xf32>
    %cst_37 = arith.constant 0.000000e+00 : f32
    %44 = vector.broadcast %cst_37 : f32 to vector<3x512xf32>
    %45 = arith.maximumf %43, %44 : vector<3x512xf32>
    %c3_38 = arith.constant 3 : index
    %c0_39 = arith.constant 0 : index
    %c0_40 = arith.constant 0 : index
    %46 = vector.load %arg4[%c3_38, %c0_39, %c0_40] : memref<4x3x512xf32, #tpu.memory_space<vmem>>, vector<1x3x512xf32>
    %47 = vector.shape_cast %46 : vector<1x3x512xf32> to vector<3x512xf32>
    %48 = vector.shape_cast %45 : vector<3x512xf32> to vector<1x3x512xf32>
    tpu.vector_store %arg4[%c3_38, %c0_39, %c0_40], %48 {strides = array<i32>} : memref<4x3x512xf32, #tpu.memory_space<vmem>>, vector<1x3x512xf32>,
    return
  }
  func.func @transform_0(%arg0: i32) -> (i32, i32, i32) {
    %c0_i32 = arith.constant 0 : i32
    %c0_i32_0 = arith.constant 0 : i32
    %c0_i32_1 = arith.constant 0 : i32
    %c0_i32_2 = arith.constant 0 : i32
    return %c0_i32, %c0_i32_0, %c0_i32_1 : i32, i32, i32
  }
  func.func @transform_1(%arg0: i32) -> (i32, i32, i32) {
    %c0_i32 = arith.constant 0 : i32
    %c0_i32_0 = arith.constant 0 : i32
    %c0_i32_1 = arith.constant 0 : i32
    return %c0_i32, %c0_i32_0, %arg0 : i32, i32, i32
  }
  func.func @transform_2(%arg0: i32) -> (i32, i32) {
    %c0_i32 = arith.constant 0 : i32
    %c0_i32_0 = arith.constant 0 : i32
    %c0_i32_1 = arith.constant 0 : i32
    return %c0_i32, %c0_i32_0 : i32, i32
  }
  func.func @transform_3(%arg0: i32) -> (i32, i32, i32) {
    %c0_i32 = arith.constant 0 : i32
    %c0_i32_0 = arith.constant 0 : i32
    %c0_i32_1 = arith.constant 0 : i32
    return %c0_i32, %c0_i32_0, %arg0 : i32, i32, i32
  }
}

module attributes {stable_mosaic.version = 11 : i64} {
  func.func @_upsample_kernel(%arg0: memref<192x32xf32, #tpu.memory_space<vmem>>, %arg1: memref<32x40xf32, #tpu.memory_space<vmem>>, %arg2: memref<40x32xf32, #tpu.memory_space<vmem>>, %arg3: memref<6x40x40xf32, #tpu.memory_space<vmem>>) attributes {dimension_semantics = [], scalar_prefetch = 0 : i64, scratch_operands = 0 : i64, tpu.core_type = #tpu.core_type<tc>} {
    %c0 = arith.constant 0 : index
    %c0_0 = arith.constant 0 : index
    %0 = vector.load %arg0[%c0, %c0_0] : memref<192x32xf32, #tpu.memory_space<vmem>>, vector<192x32xf32>
    %c0_1 = arith.constant 0 : index
    %c0_2 = arith.constant 0 : index
    %1 = vector.load %arg1[%c0_1, %c0_2] : memref<32x40xf32, #tpu.memory_space<vmem>>, vector<32x40xf32>
    %cst = arith.constant dense<0.000000e+00> : vector<192x40xf32>
    %2 = tpu.matmul %0, %1, %cst {dimension_numbers = #tpu.dot_dimension_numbers<[1], [0], [0], [1], [0, 0, 1, 1], [], []>} : vector<192x32xf32>, vector<32x40xf32>, vector<192x40xf32> -> vector<192x40xf32>
    %c0_3 = arith.constant 0 : index
    %c0_4 = arith.constant 0 : index
    %3 = vector.load %arg2[%c0_3, %c0_4] : memref<40x32xf32, #tpu.memory_space<vmem>>, vector<40x32xf32>
    %4 = vector.extract_strided_slice %2 {offsets = [0, 0], sizes = [32, 40], strides = [1, 1]} : vector<192x40xf32> to vector<32x40xf32>
    %cst_5 = arith.constant dense<0.000000e+00> : vector<40x40xf32>
    %5 = tpu.matmul %3, %4, %cst_5 {dimension_numbers = #tpu.dot_dimension_numbers<[1], [0], [0], [1], [0, 0, 1, 1], [], []>} : vector<40x32xf32>, vector<32x40xf32>, vector<40x40xf32> -> vector<40x40xf32>
    %c0_6 = arith.constant 0 : index
    %c0_7 = arith.constant 0 : index
    %c0_8 = arith.constant 0 : index
    %6 = vector.load %arg3[%c0_6, %c0_7, %c0_8] : memref<6x40x40xf32, #tpu.memory_space<vmem>>, vector<1x40x40xf32>
    %7 = vector.shape_cast %6 : vector<1x40x40xf32> to vector<40x40xf32>
    %8 = vector.shape_cast %5 : vector<40x40xf32> to vector<1x40x40xf32>
    tpu.vector_store %arg3[%c0_6, %c0_7, %c0_8], %8 {strides = array<i32>} : memref<6x40x40xf32, #tpu.memory_space<vmem>>, vector<1x40x40xf32>,
    %c0_9 = arith.constant 0 : index
    %c0_10 = arith.constant 0 : index
    %9 = vector.load %arg2[%c0_9, %c0_10] : memref<40x32xf32, #tpu.memory_space<vmem>>, vector<40x32xf32>
    %10 = vector.extract_strided_slice %2 {offsets = [32, 0], sizes = [32, 40], strides = [1, 1]} : vector<192x40xf32> to vector<32x40xf32>
    %cst_11 = arith.constant dense<0.000000e+00> : vector<40x40xf32>
    %11 = tpu.matmul %9, %10, %cst_11 {dimension_numbers = #tpu.dot_dimension_numbers<[1], [0], [0], [1], [0, 0, 1, 1], [], []>} : vector<40x32xf32>, vector<32x40xf32>, vector<40x40xf32> -> vector<40x40xf32>
    %c1 = arith.constant 1 : index
    %c0_12 = arith.constant 0 : index
    %c0_13 = arith.constant 0 : index
    %12 = vector.load %arg3[%c1, %c0_12, %c0_13] : memref<6x40x40xf32, #tpu.memory_space<vmem>>, vector<1x40x40xf32>
    %13 = vector.shape_cast %12 : vector<1x40x40xf32> to vector<40x40xf32>
    %14 = vector.shape_cast %11 : vector<40x40xf32> to vector<1x40x40xf32>
    tpu.vector_store %arg3[%c1, %c0_12, %c0_13], %14 {strides = array<i32>} : memref<6x40x40xf32, #tpu.memory_space<vmem>>, vector<1x40x40xf32>,
    %c0_14 = arith.constant 0 : index
    %c0_15 = arith.constant 0 : index
    %15 = vector.load %arg2[%c0_14, %c0_15] : memref<40x32xf32, #tpu.memory_space<vmem>>, vector<40x32xf32>
    %16 = vector.extract_strided_slice %2 {offsets = [64, 0], sizes = [32, 40], strides = [1, 1]} : vector<192x40xf32> to vector<32x40xf32>
    %cst_16 = arith.constant dense<0.000000e+00> : vector<40x40xf32>
    %17 = tpu.matmul %15, %16, %cst_16 {dimension_numbers = #tpu.dot_dimension_numbers<[1], [0], [0], [1], [0, 0, 1, 1], [], []>} : vector<40x32xf32>, vector<32x40xf32>, vector<40x40xf32> -> vector<40x40xf32>
    %c2 = arith.constant 2 : index
    %c0_17 = arith.constant 0 : index
    %c0_18 = arith.constant 0 : index
    %18 = vector.load %arg3[%c2, %c0_17, %c0_18] : memref<6x40x40xf32, #tpu.memory_space<vmem>>, vector<1x40x40xf32>
    %19 = vector.shape_cast %18 : vector<1x40x40xf32> to vector<40x40xf32>
    %20 = vector.shape_cast %17 : vector<40x40xf32> to vector<1x40x40xf32>
    tpu.vector_store %arg3[%c2, %c0_17, %c0_18], %20 {strides = array<i32>} : memref<6x40x40xf32, #tpu.memory_space<vmem>>, vector<1x40x40xf32>,
    %c0_19 = arith.constant 0 : index
    %c0_20 = arith.constant 0 : index
    %21 = vector.load %arg2[%c0_19, %c0_20] : memref<40x32xf32, #tpu.memory_space<vmem>>, vector<40x32xf32>
    %22 = vector.extract_strided_slice %2 {offsets = [96, 0], sizes = [32, 40], strides = [1, 1]} : vector<192x40xf32> to vector<32x40xf32>
    %cst_21 = arith.constant dense<0.000000e+00> : vector<40x40xf32>
    %23 = tpu.matmul %21, %22, %cst_21 {dimension_numbers = #tpu.dot_dimension_numbers<[1], [0], [0], [1], [0, 0, 1, 1], [], []>} : vector<40x32xf32>, vector<32x40xf32>, vector<40x40xf32> -> vector<40x40xf32>
    %c3 = arith.constant 3 : index
    %c0_22 = arith.constant 0 : index
    %c0_23 = arith.constant 0 : index
    %24 = vector.load %arg3[%c3, %c0_22, %c0_23] : memref<6x40x40xf32, #tpu.memory_space<vmem>>, vector<1x40x40xf32>
    %25 = vector.shape_cast %24 : vector<1x40x40xf32> to vector<40x40xf32>
    %26 = vector.shape_cast %23 : vector<40x40xf32> to vector<1x40x40xf32>
    tpu.vector_store %arg3[%c3, %c0_22, %c0_23], %26 {strides = array<i32>} : memref<6x40x40xf32, #tpu.memory_space<vmem>>, vector<1x40x40xf32>,
    %c0_24 = arith.constant 0 : index
    %c0_25 = arith.constant 0 : index
    %27 = vector.load %arg2[%c0_24, %c0_25] : memref<40x32xf32, #tpu.memory_space<vmem>>, vector<40x32xf32>
    %28 = vector.extract_strided_slice %2 {offsets = [128, 0], sizes = [32, 40], strides = [1, 1]} : vector<192x40xf32> to vector<32x40xf32>
    %cst_26 = arith.constant dense<0.000000e+00> : vector<40x40xf32>
    %29 = tpu.matmul %27, %28, %cst_26 {dimension_numbers = #tpu.dot_dimension_numbers<[1], [0], [0], [1], [0, 0, 1, 1], [], []>} : vector<40x32xf32>, vector<32x40xf32>, vector<40x40xf32> -> vector<40x40xf32>
    %c4 = arith.constant 4 : index
    %c0_27 = arith.constant 0 : index
    %c0_28 = arith.constant 0 : index
    %30 = vector.load %arg3[%c4, %c0_27, %c0_28] : memref<6x40x40xf32, #tpu.memory_space<vmem>>, vector<1x40x40xf32>
    %31 = vector.shape_cast %30 : vector<1x40x40xf32> to vector<40x40xf32>
    %32 = vector.shape_cast %29 : vector<40x40xf32> to vector<1x40x40xf32>
    tpu.vector_store %arg3[%c4, %c0_27, %c0_28], %32 {strides = array<i32>} : memref<6x40x40xf32, #tpu.memory_space<vmem>>, vector<1x40x40xf32>,
    %c0_29 = arith.constant 0 : index
    %c0_30 = arith.constant 0 : index
    %33 = vector.load %arg2[%c0_29, %c0_30] : memref<40x32xf32, #tpu.memory_space<vmem>>, vector<40x32xf32>
    %34 = vector.extract_strided_slice %2 {offsets = [160, 0], sizes = [32, 40], strides = [1, 1]} : vector<192x40xf32> to vector<32x40xf32>
    %cst_31 = arith.constant dense<0.000000e+00> : vector<40x40xf32>
    %35 = tpu.matmul %33, %34, %cst_31 {dimension_numbers = #tpu.dot_dimension_numbers<[1], [0], [0], [1], [0, 0, 1, 1], [], []>} : vector<40x32xf32>, vector<32x40xf32>, vector<40x40xf32> -> vector<40x40xf32>
    %c5 = arith.constant 5 : index
    %c0_32 = arith.constant 0 : index
    %c0_33 = arith.constant 0 : index
    %36 = vector.load %arg3[%c5, %c0_32, %c0_33] : memref<6x40x40xf32, #tpu.memory_space<vmem>>, vector<1x40x40xf32>
    %37 = vector.shape_cast %36 : vector<1x40x40xf32> to vector<40x40xf32>
    %38 = vector.shape_cast %35 : vector<40x40xf32> to vector<1x40x40xf32>
    tpu.vector_store %arg3[%c5, %c0_32, %c0_33], %38 {strides = array<i32>} : memref<6x40x40xf32, #tpu.memory_space<vmem>>, vector<1x40x40xf32>,
    return
  }
}

</mosaic_0001>

<bundles_post_ra>
// kernel: decoder_dv_pallas.4
= control target key start
LH: loop header
LB: loop body
LE: loop exit
PB: predicated region body
PF: predicated region fallthrough
CT: control target
= control target key end

     0   :  { %v681_v3 = vmov 0   ;;  %vm107_vm0 = vcmask 261120   ;;  %s942_s1 = inlined_call_operand.vmem [shape: bf16[4,32,32], index: 1, kind: input, shape index: {}]   ;;  %s943_s2 = inlined_call_operand.vmem [shape: f32[64,1], index: 2, kind: input, shape index: {}]   ;;  %s944_s0 = inlined_call_operand.vmem [shape: bf16[4,64,32], index: 0, kind: input, shape index: {}]   ;;  %s945_s3 = inlined_call_operand.vmem [shape: f32[4,64,32], index: 3, kind: output, shape index: {}]  }
   0x1   :  { %v658_v0 = vld [vmem:[%s942_s1 + $0x8] sm:$0xff]  ;;  %v664_v1 = vld [vmem:[%s942_s1 + $0x18] sm:$0xff]  ;;  %678 = vset.pattern.permute.xlu0 %v681_v3  ;;  %679 = vset.pattern.permute.xlu1 %v681_v3  ;;  %v657_v5 = vld [vmem:[%s942_s1] sm:$0xff] }
   0x2   :  { %v670_v2 = vld [vmem:[%s942_s1 + $0x28] sm:$0xff]  ;;  %v676_v4 = vld [vmem:[%s942_s1 + $0x38] sm:$0xff]  ;;  %680 = vset.pattern.permute.xlu2 %v681_v3  ;;  %126 = vmatpush.bf16.msra.mxu0 %v658_v0  ;;  %v663_v6 = vld [vmem:[%s942_s1 + $0x10] sm:$0xff] }
   0x3   :  { %229 = vmatpush.bf16.msra.mxu1 %v664_v1  ;;  %333 = vmatpush.bf16.msra.mxu2 %v670_v2  ;;  %v669_v7 = vld [vmem:[%s942_s1 + $0x20] sm:$0xff]  ;;  %v675_v8 = vld [vmem:[%s942_s1 + $0x30] sm:$0xff]  ;;  %v16_v15 = vld [vmem:[%s943_s2 + $0x8] sm:$0xff] }
   0x4   :  { %437 = vmatpush.bf16.msra.mxu3 %v676_v4  ;;  %v15_v9 = vld [vmem:[%s943_s2] sm:$0xff]  ;;  %v17_v14 = vld [vmem:[%s943_s2 + $0x10] sm:$0xff]  ;;  %v18_v16 = vld [vmem:[%s943_s2 + $0x18] sm:$0xff] }
   0x5   :  { %v653_v10 = vld [vmem:[%s944_s0] sm:$0xff]  ;;  %37 = vperm.xlu0 %678, %v15_v9   ;;  %47 = vperm.xlu1 %679, %v17_v14   ;;  %v654_v17 = vld [vmem:[%s944_s0 + $0x8] sm:$0xff]  ;;  %v22_v21 = vld [vmem:[%s943_s2 + $0x38] sm:$0xff] }
   0x6   :  { %v659_v11 = vld [vmem:[%s944_s0 + $0x20] sm:$0xff]  ;;  %127 = vmatpush.bf16.msra.mxu0 %v657_v5  ;;  %v660_v18 = vld [vmem:[%s944_s0 + $0x28] sm:$0xff]  ;;  %v21_v22 = vld [vmem:[%s943_s2 + $0x30] sm:$0xff] }
   0x7   :  { %230 = vmatpush.bf16.msra.mxu1 %v663_v6  ;;  %v665_v12 = vld [vmem:[%s944_s0 + $0x40] sm:$0xff]  ;;  %334 = vmatpush.bf16.msra.mxu2 %v669_v7  ;;  %v666_v19 = vld [vmem:[%s944_s0 + $0x48] sm:$0xff]  ;;  %v655_v25 = vld [vmem:[%s944_s0 + $0x10] sm:$0xff] }
   0x8   :  { %v671_v13 = vld [vmem:[%s944_s0 + $0x60] sm:$0xff]  ;;  %438 = vmatpush.bf16.msra.mxu3 %v675_v8  ;;  %v672_v20 = vld [vmem:[%s944_s0 + $0x68] sm:$0xff]  ;;  %v661_v26 = vld [vmem:[%s944_s0 + $0x30] sm:$0xff] }
   0x9   :  { %505 = vmatmul.msk.bf16.vlgmr.msra.gmra.mxu0 %vm107_vm0, %v653_v10  ;;  %v19_v23 = vld [vmem:[%s943_s2 + $0x20] sm:$0xff]  ;;  %v20_v24 = vld [vmem:[%s943_s2 + $0x28] sm:$0xff]  ;;  %v667_v27 = vld [vmem:[%s944_s0 + $0x50] sm:$0xff] }
   0xa   :  { %545 = vmatmul.msk.bf16.vlgmr.msra.gmra.mxu1 %vm107_vm0, %v659_v11  ;;  %593 = vmatmul.msk.bf16.vlgmr.msra.gmra.mxu2 %vm107_vm0, %v665_v12  ;;  %v673_v28 = vld [vmem:[%s944_s0 + $0x70] sm:$0xff]  ;;  %v656_v29 = vld [vmem:[%s944_s0 + $0x18] sm:$0xff] }
   0xb   :  { %641 = vmatmul.msk.bf16.vlgmr.msra.gmra.mxu3 %vm107_vm0, %v671_v13  ;;  %57 = vperm.xlu2 %680, %v19_v23   ;;  %v662_v30 = vld [vmem:[%s944_s0 + $0x38] sm:$0xff] }
   0xc   :  { %v668_v31 = vld [vmem:[%s944_s0 + $0x58] sm:$0xff] }
   0xd   :  { %42 = vperm.xlu0 %678, %v16_v15   ;;  %52 = vperm.xlu1 %679, %v18_v16   ;;  %v674_v32 = vld [vmem:[%s944_s0 + $0x78] sm:$0xff] }
  0x13   :  { %62 = vperm.xlu2 %680, %v20_v24  }
  0x15   :  { %72 = vperm.xlu1 %679, %v22_v21   ;;  %67 = vperm.xlu0 %678, %v21_v22  }
  0x19   :  { %506 = vmatmul.msk.bf16.gmra.mxu0 %vm107_vm0, %v654_v17 }
  0x1a   :  { %546 = vmatmul.msk.bf16.gmra.mxu1 %vm107_vm0, %v660_v18  ;;  %594 = vmatmul.msk.bf16.gmra.mxu2 %vm107_vm0, %v666_v19 }
  0x1b   :  { %642 = vmatmul.msk.bf16.gmra.mxu3 %vm107_vm0, %v672_v20 }
  0x29   :  { %507 = vmatmul.msk.bf16.gmra.mxu0 %vm107_vm0, %v655_v25 }
  0x2a   :  { %547 = vmatmul.msk.bf16.gmra.mxu1 %vm107_vm0, %v661_v26  ;;  %595 = vmatmul.msk.bf16.gmra.mxu2 %vm107_vm0, %v667_v27 }
  0x2b   :  { %643 = vmatmul.msk.bf16.gmra.mxu3 %vm107_vm0, %v673_v28 }
  0x39   :  { %508 = vmatmul.msk.bf16.gmra.mxu0 %vm107_vm0, %v656_v29 }
  0x3a   :  { %548 = vmatmul.msk.bf16.gmra.mxu1 %vm107_vm0, %v662_v30  ;;  %596 = vmatmul.msk.bf16.gmra.mxu2 %vm107_vm0, %v668_v31 }
  0x3b   :  { %644 = vmatmul.msk.bf16.gmra.mxu3 %vm107_vm0, %v674_v32 }
  0x65   :  { %v58_v15 = vpop.permute.xlu2 %57 }
  0x6d   :  { %v63_v28 = vpop.permute.xlu2 %62 }
  0x77   :  { %v38_v33 = vpop.permute.xlu0 %37  ;;  %v48_v53 = vpop.permute.xlu1 %47 }
  0x7f   :  { %v43_v40 = vpop.permute.xlu0 %42  ;;  %v53_v2 = vpop.permute.xlu1 %52 }
  0x86   :  { %v129_v34 = vpop.f32.mrf.mxu0 }
  0x87   :  { %v232_v35 = vpop.f32.mrf.mxu1  ;;  %v130_v36 = vadd.f32 %v129_v34, %v38_v33 }
  0x88   :  { %v233_v37 = vadd.f32 %v232_v35, %v38_v33 }
  0x89   :  { %v149_v38 = vmax.f32 %v130_v36, 0.0 }
  0x8a   :  { %v252_v39 = vmax.f32 %v233_v37, 0.0 }
  0x8b   :  { %157 = vst.msk [vmem:[%s945_s3] sm:$0xff] %vm107_vm0, %v149_v38 }
  0x8c   :  { %549 = vst.msk [vmem:[%s945_s3 + $0x40] sm:$0xff] %vm107_vm0, %v252_v39 }
  0x8d   :  { %v336_v41 = vpop.f32.mrf.mxu2 }
  0x8e   :  { %v440_v42 = vpop.f32.mrf.mxu3  ;;  %v337_v43 = vadd.f32 %v336_v41, %v38_v33  ;;  %v131_v45 = vpop.f32.mrf.mxu0 }
  0x8f   :  { %v441_v44 = vadd.f32 %v440_v42, %v38_v33  ;;  %v234_v46 = vpop.f32.mrf.mxu1  ;;  %v132_v47 = vadd.f32 %v131_v45, %v43_v40  ;;  %v68_v41 = vpop.permute.xlu0 %67 }
  0x90   :  { %v235_v48 = vadd.f32 %v234_v46, %v43_v40  ;;  %v356_v49 = vmax.f32 %v337_v43, 0.0 }
  0x91   :  { %v460_v50 = vmax.f32 %v441_v44, 0.0  ;;  %v150_v51 = vmax.f32 %v132_v47, 0.0 }
  0x92   :  { %v253_v52 = vmax.f32 %v235_v48, 0.0  ;;  %597 = vst.msk [vmem:[%s945_s3 + $0x80] sm:$0xff] %vm107_vm0, %v356_v49 }
  0x93   :  { %645 = vst.msk [vmem:[%s945_s3 + $0xc0] sm:$0xff] %vm107_vm0, %v460_v50 }
  0x94   :  { %158 = vst.msk [vmem:[%s945_s3 + $0x8] sm:$0xff] %vm107_vm0, %v150_v51 }
  0x95   :  { %550 = vst.msk [vmem:[%s945_s3 + $0x48] sm:$0xff] %vm107_vm0, %v253_v52  ;;  %v338_v54 = vpop.f32.mrf.mxu2 }
  0x96   :  { %v442_v55 = vpop.f32.mrf.mxu3  ;;  %v339_v56 = vadd.f32 %v338_v54, %v43_v40  ;;  %v134_v58 = vpop.f32.mrf.mxu0 }
  0x97   :  { %v443_v57 = vadd.f32 %v442_v55, %v43_v40  ;;  %v237_v59 = vpop.f32.mrf.mxu1  ;;  %v135_v60 = vadd.f32 %v134_v58, %v48_v53  ;;  %v73_v54 = vpop.permute.xlu1 %72 }
  0x98   :  { %v238_v61 = vadd.f32 %v237_v59, %v48_v53  ;;  %v357_v62 = vmax.f32 %v339_v56, 0.0 }
  0x99   :  { %v461_v63 = vmax.f32 %v443_v57, 0.0  ;;  %v151_v0 = vmax.f32 %v135_v60, 0.0 }
  0x9a   :  { %v254_v1 = vmax.f32 %v238_v61, 0.0  ;;  %598 = vst.msk [vmem:[%s945_s3 + $0x88] sm:$0xff] %vm107_vm0, %v357_v62 }
  0x9b   :  { %646 = vst.msk [vmem:[%s945_s3 + $0xc8] sm:$0xff] %vm107_vm0, %v461_v63 }
  0x9c   :  { %159 = vst.msk [vmem:[%s945_s3 + $0x10] sm:$0xff] %vm107_vm0, %v151_v0 }
  0x9d   :  { %551 = vst.msk [vmem:[%s945_s3 + $0x50] sm:$0xff] %vm107_vm0, %v254_v1  ;;  %v341_v3 = vpop.f32.mrf.mxu2 }
  0x9e   :  { %v445_v4 = vpop.f32.mrf.mxu3  ;;  %v342_v5 = vadd.f32 %v341_v3, %v48_v53  ;;  %v136_v7 = vpop.f32.mrf.mxu0 }
  0x9f   :  { %v446_v6 = vadd.f32 %v445_v4, %v48_v53  ;;  %v239_v8 = vpop.f32.mrf.mxu1  ;;  %v137_v9 = vadd.f32 %v136_v7, %v53_v2 }
  0xa0   :  { %v240_v10 = vadd.f32 %v239_v8, %v53_v2  ;;  %v358_v11 = vmax.f32 %v342_v5, 0.0 }
  0xa1   :  { %v462_v12 = vmax.f32 %v446_v6, 0.0  ;;  %v152_v13 = vmax.f32 %v137_v9, 0.0 }
  0xa2   :  { %v255_v14 = vmax.f32 %v240_v10, 0.0  ;;  %599 = vst.msk [vmem:[%s945_s3 + $0x90] sm:$0xff] %vm107_vm0, %v358_v11 }
  0xa3   :  { %647 = vst.msk [vmem:[%s945_s3 + $0xd0] sm:$0xff] %vm107_vm0, %v462_v12 }
  0xa4   :  { %160 = vst.msk [vmem:[%s945_s3 + $0x18] sm:$0xff] %vm107_vm0, %v152_v13 }
  0xa5   :  { %552 = vst.msk [vmem:[%s945_s3 + $0x58] sm:$0xff] %vm107_vm0, %v255_v14  ;;  %v343_v16 = vpop.f32.mrf.mxu2 }
  0xa6   :  { %v447_v17 = vpop.f32.mrf.mxu3  ;;  %v344_v18 = vadd.f32 %v343_v16, %v53_v2  ;;  %v139_v20 = vpop.f32.mrf.mxu0 }
  0xa7   :  { %v448_v19 = vadd.f32 %v447_v17, %v53_v2  ;;  %v242_v21 = vpop.f32.mrf.mxu1  ;;  %v140_v22 = vadd.f32 %v139_v20, %v58_v15 }
  0xa8   :  { %v243_v23 = vadd.f32 %v242_v21, %v58_v15  ;;  %v359_v24 = vmax.f32 %v344_v18, 0.0 }
  0xa9   :  { %v463_v25 = vmax.f32 %v448_v19, 0.0  ;;  %v153_v26 = vmax.f32 %v140_v22, 0.0 }
  0xaa   :  { %v256_v27 = vmax.f32 %v243_v23, 0.0  ;;  %600 = vst.msk [vmem:[%s945_s3 + $0x98] sm:$0xff] %vm107_vm0, %v359_v24 }
  0xab   :  { %648 = vst.msk [vmem:[%s945_s3 + $0xd8] sm:$0xff] %vm107_vm0, %v463_v25 }
  0xac   :  { %161 = vst.msk [vmem:[%s945_s3 + $0x20] sm:$0xff] %vm107_vm0, %v153_v26 }
  0xad   :  { %553 = vst.msk [vmem:[%s945_s3 + $0x60] sm:$0xff] %vm107_vm0, %v256_v27  ;;  %v346_v29 = vpop.f32.mrf.mxu2 }
  0xae   :  { %v450_v30 = vpop.f32.mrf.mxu3  ;;  %v347_v31 = vadd.f32 %v346_v29, %v58_v15  ;;  %v141_v33 = vpop.f32.mrf.mxu0 }
  0xaf   :  { %v451_v32 = vadd.f32 %v450_v30, %v58_v15  ;;  %v244_v34 = vpop.f32.mrf.mxu1  ;;  %v142_v35 = vadd.f32 %v141_v33, %v63_v28 }
  0xb0   :  { %v245_v36 = vadd.f32 %v244_v34, %v63_v28  ;;  %v360_v37 = vmax.f32 %v347_v31, 0.0 }
  0xb1   :  { %v464_v38 = vmax.f32 %v451_v32, 0.0  ;;  %v154_v39 = vmax.f32 %v142_v35, 0.0 }
  0xb2   :  { %v257_v40 = vmax.f32 %v245_v36, 0.0  ;;  %601 = vst.msk [vmem:[%s945_s3 + $0xa0] sm:$0xff] %vm107_vm0, %v360_v37 }
  0xb3   :  { %649 = vst.msk [vmem:[%s945_s3 + $0xe0] sm:$0xff] %vm107_vm0, %v464_v38 }
  0xb4   :  { %162 = vst.msk [vmem:[%s945_s3 + $0x28] sm:$0xff] %vm107_vm0, %v154_v39 }
  0xb5   :  { %554 = vst.msk [vmem:[%s945_s3 + $0x68] sm:$0xff] %vm107_vm0, %v257_v40  ;;  %v348_v42 = vpop.f32.mrf.mxu2 }
  0xb6   :  { %v452_v43 = vpop.f32.mrf.mxu3  ;;  %v349_v44 = vadd.f32 %v348_v42, %v63_v28  ;;  %v144_v46 = vpop.f32.mrf.mxu0 }
  0xb7   :  { %v453_v45 = vadd.f32 %v452_v43, %v63_v28  ;;  %v247_v47 = vpop.f32.mrf.mxu1  ;;  %v145_v48 = vadd.f32 %v144_v46, %v68_v41 }
  0xb8   :  { %v248_v49 = vadd.f32 %v247_v47, %v68_v41  ;;  %v361_v50 = vmax.f32 %v349_v44, 0.0 }
  0xb9   :  { %v465_v51 = vmax.f32 %v453_v45, 0.0  ;;  %v155_v52 = vmax.f32 %v145_v48, 0.0 }
  0xba   :  { %v258_v53 = vmax.f32 %v248_v49, 0.0  ;;  %602 = vst.msk [vmem:[%s945_s3 + $0xa8] sm:$0xff] %vm107_vm0, %v361_v50 }
  0xbb   :  { %650 = vst.msk [vmem:[%s945_s3 + $0xe8] sm:$0xff] %vm107_vm0, %v465_v51 }
  0xbc   :  { %163 = vst.msk [vmem:[%s945_s3 + $0x30] sm:$0xff] %vm107_vm0, %v155_v52 }
  0xbd   :  { %555 = vst.msk [vmem:[%s945_s3 + $0x70] sm:$0xff] %vm107_vm0, %v258_v53  ;;  %v351_v55 = vpop.f32.mrf.mxu2 }
  0xbe   :  { %v455_v56 = vpop.f32.mrf.mxu3  ;;  %v352_v57 = vadd.f32 %v351_v55, %v68_v41  ;;  %v146_v59 = vpop.f32.mrf.mxu0 }
  0xbf   :  { %v456_v58 = vadd.f32 %v455_v56, %v68_v41  ;;  %v249_v60 = vpop.f32.mrf.mxu1  ;;  %v147_v61 = vadd.f32 %v146_v59, %v73_v54 }
  0xc0   :  { %v250_v62 = vadd.f32 %v249_v60, %v73_v54  ;;  %v362_v63 = vmax.f32 %v352_v57, 0.0 }
  0xc1   :  { %v466_v0 = vmax.f32 %v456_v58, 0.0  ;;  %v156_v1 = vmax.f32 %v147_v61, 0.0 }
  0xc2   :  { %v259_v2 = vmax.f32 %v250_v62, 0.0  ;;  %603 = vst.msk [vmem:[%s945_s3 + $0xb0] sm:$0xff] %vm107_vm0, %v362_v63 }
  0xc3   :  { %651 = vst.msk [vmem:[%s945_s3 + $0xf0] sm:$0xff] %vm107_vm0, %v466_v0 }
  0xc4   :  { %164 = vst.msk [vmem:[%s945_s3 + $0x38] sm:$0xff] %vm107_vm0, %v156_v1 }
  0xc5   :  { %556 = vst.msk [vmem:[%s945_s3 + $0x78] sm:$0xff] %vm107_vm0, %v259_v2  ;;  %v353_v3 = vpop.f32.mrf.mxu2 }
  0xc6   :  { %v457_v4 = vpop.f32.mrf.mxu3  ;;  %v354_v5 = vadd.f32 %v353_v3, %v73_v54 }
  0xc7   :  { %v458_v6 = vadd.f32 %v457_v4, %v73_v54 }
  0xc8   :  { %v363_v7 = vmax.f32 %v354_v5, 0.0 }
  0xc9   :  { %v467_v8 = vmax.f32 %v458_v6, 0.0 }
  0xca   :  { %604 = vst.msk [vmem:[%s945_s3 + $0xb8] sm:$0xff] %vm107_vm0, %v363_v7 }
  0xcb   :  { %652 = vst.msk [vmem:[%s945_s3 + $0xf8] sm:$0xff] %vm107_vm0, %v467_v8 }

// kernel: decoder_dv_pallas.5
= control target key start
LH: loop header
LB: loop body
LE: loop exit
PB: predicated region body
PF: predicated region fallthrough
CT: control target
= control target key end

     0   :  { %v1366_v20 = vmov 0   ;;  %s1753_s1 = inlined_call_operand.vmem [shape: bf16[4,256,128], index: 1, kind: input, shape index: {}]   ;;  %s1754_s2 = inlined_call_operand.vmem [shape: f32[32,1], index: 2, kind: input, shape index: {}]   ;;  %s1755_s0 = inlined_call_operand.vmem [shape: bf16[4,32,256], index: 0, kind: input, shape index: {}]   ;;  %s1756_s3 = inlined_call_operand.vmem [shape: f32[4,32,128], index: 3, kind: output, shape index: {}]  }
   0x1   :  { %v1294_v0 = vld [vmem:[%s1753_s1 + $0x38] sm:$0xff]  ;;  %v1293_v4 = vld [vmem:[%s1753_s1 + $0x30] sm:$0xff]  ;;  %v1292_v8 = vld [vmem:[%s1753_s1 + $0x28] sm:$0xff]  ;;  %1364 = vset.pattern.permute.xlu0 %v1366_v20  ;;  %1365 = vset.pattern.permute.xlu1 %v1366_v20 }
   0x2   :  { %v1302_v1 = vld [vmem:[%s1753_s1 + $0x78] sm:$0xff]  ;;  %190 = vmatpush.bf16.msra.mxu0 %v1294_v0  ;;  %v1301_v5 = vld [vmem:[%s1753_s1 + $0x70] sm:$0xff]  ;;  %v1300_v9 = vld [vmem:[%s1753_s1 + $0x68] sm:$0xff] }
   0x3   :  { %v1314_v2 = vld [vmem:[%s1753_s1 + $0xb8] sm:$0xff]  ;;  %209 = vmatpush.bf16.msra.mxu1 %v1302_v1  ;;  %v1313_v6 = vld [vmem:[%s1753_s1 + $0xb0] sm:$0xff]  ;;  %v1312_v10 = vld [vmem:[%s1753_s1 + $0xa8] sm:$0xff] }
   0x4   :  { %v1322_v3 = vld [vmem:[%s1753_s1 + $0xf8] sm:$0xff]  ;;  %390 = vmatpush.bf16.msra.mxu2 %v1314_v2  ;;  %v1321_v7 = vld [vmem:[%s1753_s1 + $0xf0] sm:$0xff]  ;;  %v1320_v11 = vld [vmem:[%s1753_s1 + $0xe8] sm:$0xff] }
   0x5   :  { %409 = vmatpush.bf16.msra.mxu3 %v1322_v3  ;;  %v1291_v12 = vld [vmem:[%s1753_s1 + $0x20] sm:$0xff]  ;;  %v1290_v16 = vld [vmem:[%s1753_s1 + $0x18] sm:$0xff]  ;;  %v1289_v22 = vld [vmem:[%s1753_s1 + $0x10] sm:$0xff] }
   0x6   :  { %191 = vmatpush.bf16.msra.mxu0 %v1293_v4  ;;  %v1299_v13 = vld [vmem:[%s1753_s1 + $0x60] sm:$0xff]  ;;  %v1298_v17 = vld [vmem:[%s1753_s1 + $0x58] sm:$0xff]  ;;  %v1297_v23 = vld [vmem:[%s1753_s1 + $0x50] sm:$0xff] }
   0x7   :  { %210 = vmatpush.bf16.msra.mxu1 %v1301_v5  ;;  %v1311_v14 = vld [vmem:[%s1753_s1 + $0xa0] sm:$0xff]  ;;  %v1310_v18 = vld [vmem:[%s1753_s1 + $0x98] sm:$0xff]  ;;  %v1309_v24 = vld [vmem:[%s1753_s1 + $0x90] sm:$0xff] }
   0x8   :  { %391 = vmatpush.bf16.msra.mxu2 %v1313_v6  ;;  %v1319_v15 = vld [vmem:[%s1753_s1 + $0xe0] sm:$0xff]  ;;  %v1318_v19 = vld [vmem:[%s1753_s1 + $0xd8] sm:$0xff]  ;;  %v1317_v25 = vld [vmem:[%s1753_s1 + $0xd0] sm:$0xff] }
   0x9   :  { %410 = vmatpush.bf16.msra.mxu3 %v1321_v7  ;;  %v14_v21 = vld [vmem:[%s1754_s2] sm:$0xff]  ;;  %v1288_v26 = vld [vmem:[%s1753_s1 + $0x8] sm:$0xff]  ;;  %v16_v43 = vld [vmem:[%s1754_s2 + $0x10] sm:$0xff] }
   0xa   :  { %192 = vmatpush.bf16.msra.mxu0 %v1292_v8  ;;  %56 = vperm.xlu0 %1364, %v14_v21   ;;  %v1296_v27 = vld [vmem:[%s1753_s1 + $0x48] sm:$0xff]  ;;  %v1287_v30 = vld [vmem:[%s1753_s1] sm:$0xff]  ;;  %v1354_v44 = vld [vmem:[%s1753_s1 + $0x1b8] sm:$0xff] }
   0xb   :  { %211 = vmatpush.bf16.msra.mxu1 %v1300_v9  ;;  %v1308_v28 = vld [vmem:[%s1753_s1 + $0x88] sm:$0xff]  ;;  %v1295_v31 = vld [vmem:[%s1753_s1 + $0x40] sm:$0xff]  ;;  %v1334_v45 = vld [vmem:[%s1753_s1 + $0x138] sm:$0xff]  ;;  %66 = vperm.xlu1 %1365, %v16_v43  }
   0xc   :  { %392 = vmatpush.bf16.msra.mxu2 %v1312_v10  ;;  %v1316_v29 = vld [vmem:[%s1753_s1 + $0xc8] sm:$0xff]  ;;  %v845_v32 = vld [vmem:[%s1755_s0] sm:$0xf]  ;;  %v1283_v36 = vld [vmem:[%s1755_s0 + $0x4] sm:$0xf] }
   0xd   :  { %411 = vmatpush.bf16.msra.mxu3 %v1320_v11  ;;  %v1307_v33 = vld [vmem:[%s1753_s1 + $0x80] sm:$0xff]  ;;  %v1284_v35 = vld [vmem:[%s1755_s0 + $0x4] sm:$0xf0]  ;;  %v847_v38 = vld [vmem:[%s1755_s0 + $0x8] sm:$0xf0] }
   0xe   :  { %193 = vmatpush.bf16.msra.mxu0 %v1291_v12  ;;  %v1315_v34 = vld [vmem:[%s1753_s1 + $0xc0] sm:$0xff]  ;;  %v15_v37 = vld [vmem:[%s1754_s2 + $0x8] sm:$0xff]  ;;  %v846_v46 = vor.u32 %v1284_v35, %v845_v32  ;;  %v850_v47 = vor.u32 %v1283_v36, %v847_v38  ;;  %v1342_v50 = vld [vmem:[%s1753_s1 + $0x178] sm:$0xff] }
   0xf   :  { %212 = vmatpush.bf16.msra.mxu1 %v1299_v13  ;;  %v961_v39 = vld [vmem:[%s1755_s0 + $0x20] sm:$0xf]  ;;  %v1304_v40 = vld [vmem:[%s1755_s0 + $0x24] sm:$0xf0]  ;;  %v1303_v41 = vld [vmem:[%s1755_s0 + $0x24] sm:$0xf] }
  0x10   :  { %393 = vmatpush.bf16.msra.mxu2 %v1311_v14  ;;  %v963_v42 = vld [vmem:[%s1755_s0 + $0x28] sm:$0xf0]  ;;  %v962_v48 = vor.u32 %v1304_v40, %v961_v39  ;;  %v1362_v51 = vld [vmem:[%s1753_s1 + $0x1f8] sm:$0xff]  ;;  %v1353_v52 = vld [vmem:[%s1753_s1 + $0x1b0] sm:$0xff] }
  0x11   :  { %412 = vmatpush.bf16.msra.mxu3 %v1319_v15  ;;  %v966_v49 = vor.u32 %v1303_v41, %v963_v42  ;;  %v1333_v53 = vld [vmem:[%s1753_s1 + $0x130] sm:$0xff]  ;;  %v17_v56 = vld [vmem:[%s1754_s2 + $0x18] sm:$0xff]  ;;  %v1352_v57 = vld [vmem:[%s1753_s1 + $0x1a8] sm:$0xff] }
  0x12   :  { %194 = vmatpush.bf16.msra.mxu0 %v1290_v16  ;;  %61 = vperm.xlu0 %1364, %v15_v37   ;;  %v1341_v54 = vld [vmem:[%s1753_s1 + $0x170] sm:$0xff]  ;;  %v1332_v58 = vld [vmem:[%s1753_s1 + $0x128] sm:$0xff]  ;;  %v1351_v61 = vld [vmem:[%s1753_s1 + $0x1a0] sm:$0xff] }
  0x13   :  { %213 = vmatpush.bf16.msra.mxu1 %v1298_v17  ;;  %v1361_v55 = vld [vmem:[%s1753_s1 + $0x1f0] sm:$0xff]  ;;  %71 = vperm.xlu1 %1365, %v17_v56   ;;  %v1340_v59 = vld [vmem:[%s1753_s1 + $0x168] sm:$0xff]  ;;  %v1331_v62 = vld [vmem:[%s1753_s1 + $0x120] sm:$0xff] }
  0x14   :  { %394 = vmatpush.bf16.msra.mxu2 %v1310_v18  ;;  %v1360_v60 = vld [vmem:[%s1753_s1 + $0x1e8] sm:$0xff]  ;;  %v1339_v63 = vld [vmem:[%s1753_s1 + $0x160] sm:$0xff]  ;;  %v853_v1 = vld [vmem:[%s1755_s0 + $0x10] sm:$0xf] }
  0x15   :  { %413 = vmatpush.bf16.msra.mxu3 %v1318_v19  ;;  %v1359_v0 = vld [vmem:[%s1753_s1 + $0x1e0] sm:$0xff]  ;;  %v1286_v2 = vld [vmem:[%s1755_s0 + $0x14] sm:$0xf0]  ;;  %v1285_v3 = vld [vmem:[%s1755_s0 + $0x14] sm:$0xf] }
  0x16   :  { %195 = vmatpush.bf16.msra.mxu0 %v1289_v22  ;;  %v855_v4 = vld [vmem:[%s1755_s0 + $0x18] sm:$0xf0]  ;;  %v969_v5 = vld [vmem:[%s1755_s0 + $0x30] sm:$0xf]  ;;  %v1306_v6 = vld [vmem:[%s1755_s0 + $0x34] sm:$0xf0]  ;;  %v854_v11 = vor.u32 %v1286_v2, %v853_v1 }
  0x17   :  { %214 = vmatpush.bf16.msra.mxu1 %v1297_v23  ;;  %v1305_v7 = vld [vmem:[%s1755_s0 + $0x34] sm:$0xf]  ;;  %v971_v8 = vld [vmem:[%s1755_s0 + $0x38] sm:$0xf0]  ;;  %v858_v12 = vor.u32 %v1285_v3, %v855_v4  ;;  %v970_v13 = vor.u32 %v1306_v6, %v969_v5  ;;  %v1348_v21 = vld [vmem:[%s1753_s1 + $0x188] sm:$0xff] }
  0x18   :  { %395 = vmatpush.bf16.msra.mxu2 %v1309_v24  ;;  %v1350_v9 = vld [vmem:[%s1753_s1 + $0x198] sm:$0xff]  ;;  %v974_v14 = vor.u32 %v1305_v7, %v971_v8  ;;  %v1349_v17 = vld [vmem:[%s1753_s1 + $0x190] sm:$0xff]  ;;  %v1328_v22 = vld [vmem:[%s1753_s1 + $0x108] sm:$0xff] }
  0x19   :  { %414 = vmatpush.bf16.msra.mxu3 %v1317_v25  ;;  %v1330_v10 = vld [vmem:[%s1753_s1 + $0x118] sm:$0xff]  ;;  %v1329_v18 = vld [vmem:[%s1753_s1 + $0x110] sm:$0xff]  ;;  %v1336_v23 = vld [vmem:[%s1753_s1 + $0x148] sm:$0xff] }
  0x1a   :  { %196 = vmatpush.bf16.msra.mxu0 %v1288_v26  ;;  %v1338_v15 = vld [vmem:[%s1753_s1 + $0x158] sm:$0xff]  ;;  %v1337_v19 = vld [vmem:[%s1753_s1 + $0x150] sm:$0xff]  ;;  %v1356_v24 = vld [vmem:[%s1753_s1 + $0x1c8] sm:$0xff] }
  0x1b   :  { %215 = vmatpush.bf16.msra.mxu1 %v1296_v27  ;;  %v1358_v16 = vld [vmem:[%s1753_s1 + $0x1d8] sm:$0xff]  ;;  %v1357_v20 = vld [vmem:[%s1753_s1 + $0x1d0] sm:$0xff]  ;;  %v1347_v25 = vld [vmem:[%s1753_s1 + $0x180] sm:$0xff] }
  0x1c   :  { %396 = vmatpush.bf16.msra.mxu2 %v1308_v28  ;;  %v1327_v26 = vld [vmem:[%s1753_s1 + $0x100] sm:$0xff]  ;;  %v1083_v32 = vld [vmem:[%s1755_s0 + $0x48] sm:$0xf0]  ;;  %v1089_v41 = vld [vmem:[%s1755_s0 + $0x50] sm:$0xf] }
  0x1d   :  { %415 = vmatpush.bf16.msra.mxu3 %v1316_v29  ;;  %v1335_v27 = vld [vmem:[%s1753_s1 + $0x140] sm:$0xff]  ;;  %v1203_v36 = vld [vmem:[%s1755_s0 + $0x68] sm:$0xf0]  ;;  %v1326_v42 = vld [vmem:[%s1755_s0 + $0x54] sm:$0xf0] }
  0x1e   :  { %197 = vmatpush.bf16.msra.mxu0 %v1287_v30  ;;  %v1355_v28 = vld [vmem:[%s1753_s1 + $0x1c0] sm:$0xff]  ;;  %v1324_v30 = vld [vmem:[%s1755_s0 + $0x44] sm:$0xf0]  ;;  %v1325_v43 = vld [vmem:[%s1755_s0 + $0x54] sm:$0xf] }
  0x1f   :  { %216 = vmatpush.bf16.msra.mxu1 %v1295_v31  ;;  %v1081_v29 = vld [vmem:[%s1755_s0 + $0x40] sm:$0xf]  ;;  %v1323_v31 = vld [vmem:[%s1755_s0 + $0x44] sm:$0xf] }
  0x20   :  { %397 = vmatpush.bf16.msra.mxu2 %v1307_v33  ;;  %v1201_v33 = vld [vmem:[%s1755_s0 + $0x60] sm:$0xf]  ;;  %v1343_v35 = vld [vmem:[%s1755_s0 + $0x64] sm:$0xf]  ;;  %v1082_v37 = vor.u32 %v1324_v30, %v1081_v29  ;;  %v1086_v38 = vor.u32 %v1323_v31, %v1083_v32 }
  0x21   :  { %416 = vmatpush.bf16.msra.mxu3 %v1315_v34  ;;  %198 = vmatmul.bf16.vlgmr.msra.gmra.mxu0 %v846_v46  ;;  %v1344_v34 = vld [vmem:[%s1755_s0 + $0x64] sm:$0xf0]  ;;  %v1206_v40 = vor.u32 %v1343_v35, %v1203_v36  ;;  %v1346_v46 = vld [vmem:[%s1755_s0 + $0x74] sm:$0xf0] }
  0x22   :  { %591 = vmatpush.bf16.msrb.mxu0 %v1334_v45  ;;  %217 = vmatmul.bf16.vlgmr.msra.gmra.mxu1 %v850_v47  ;;  %v1202_v39 = vor.u32 %v1344_v34, %v1201_v33  ;;  %v1209_v45 = vld [vmem:[%s1755_s0 + $0x70] sm:$0xf]  ;;  %v1345_v47 = vld [vmem:[%s1755_s0 + $0x74] sm:$0xf] }
  0x23   :  { %398 = vmatmul.bf16.vlgmr.msra.gmra.mxu2 %v962_v48  ;;  %610 = vmatpush.bf16.msrb.mxu1 %v1342_v50  ;;  %v1211_v48 = vld [vmem:[%s1755_s0 + $0x78] sm:$0xf0] }
  0x24   :  { %792 = vmatpush.bf16.msrb.mxu2 %v1354_v44  ;;  %417 = vmatmul.bf16.vlgmr.msra.gmra.mxu3 %v966_v49  ;;  %v1091_v44 = vld [vmem:[%s1755_s0 + $0x58] sm:$0xf0]  ;;  %v1090_v49 = vor.u32 %v1326_v42, %v1089_v41 }
  0x25   :  { %811 = vmatpush.bf16.msrb.mxu3 %v1362_v51  ;;  %v1094_v50 = vor.u32 %v1325_v43, %v1091_v44  ;;  %v1210_v51 = vor.u32 %v1346_v46, %v1209_v45 }
  0x26   :  { %592 = vmatpush.bf16.msrb.mxu0 %v1333_v53 }
  0x27   :  { %611 = vmatpush.bf16.msrb.mxu1 %v1341_v54 }
  0x28   :  { %793 = vmatpush.bf16.msrb.mxu2 %v1353_v52  ;;  %v1214_v52 = vor.u32 %v1345_v47, %v1211_v48 }
  0x29   :  { %812 = vmatpush.bf16.msrb.mxu3 %v1361_v55 }
  0x2a   :  { %593 = vmatpush.bf16.msrb.mxu0 %v1332_v58 }
  0x2b   :  { %612 = vmatpush.bf16.msrb.mxu1 %v1340_v59 }
  0x2c   :  { %794 = vmatpush.bf16.msrb.mxu2 %v1352_v57 }
  0x2d   :  { %813 = vmatpush.bf16.msrb.mxu3 %v1360_v60 }
  0x2e   :  { %594 = vmatpush.bf16.msrb.mxu0 %v1331_v62 }
  0x2f   :  { %613 = vmatpush.bf16.msrb.mxu1 %v1339_v63 }
  0x30   :  { %795 = vmatpush.bf16.msrb.mxu2 %v1351_v61 }
  0x31   :  { %814 = vmatpush.bf16.msrb.mxu3 %v1359_v0  ;;  %203 = vmatmul.bf16.gmra.mxu0 %v854_v11 }
  0x32   :  { %595 = vmatpush.bf16.msrb.mxu0 %v1330_v10  ;;  %222 = vmatmul.bf16.gmra.mxu1 %v858_v12 }
  0x33   :  { %403 = vmatmul.bf16.gmra.mxu2 %v970_v13  ;;  %614 = vmatpush.bf16.msrb.mxu1 %v1338_v15 }
  0x34   :  { %796 = vmatpush.bf16.msrb.mxu2 %v1350_v9  ;;  %422 = vmatmul.bf16.gmra.mxu3 %v974_v14 }
  0x35   :  { %815 = vmatpush.bf16.msrb.mxu3 %v1358_v16 }
  0x36   :  { %596 = vmatpush.bf16.msrb.mxu0 %v1329_v18 }
  0x37   :  { %615 = vmatpush.bf16.msrb.mxu1 %v1337_v19 }
  0x38   :  { %797 = vmatpush.bf16.msrb.mxu2 %v1349_v17 }
  0x39   :  { %816 = vmatpush.bf16.msrb.mxu3 %v1357_v20 }
  0x3a   :  { %597 = vmatpush.bf16.msrb.mxu0 %v1328_v22 }
  0x3b   :  { %616 = vmatpush.bf16.msrb.mxu1 %v1336_v23 }
  0x3c   :  { %798 = vmatpush.bf16.msrb.mxu2 %v1348_v21 }
  0x3d   :  { %817 = vmatpush.bf16.msrb.mxu3 %v1356_v24 }
  0x3e   :  { %598 = vmatpush.bf16.msrb.mxu0 %v1327_v26 }
  0x3f   :  { %617 = vmatpush.bf16.msrb.mxu1 %v1335_v27 }
  0x40   :  { %799 = vmatpush.bf16.msrb.mxu2 %v1347_v25 }
  0x41   :  { %818 = vmatpush.bf16.msrb.mxu3 %v1355_v28  ;;  %599 = vmatmul.bf16.vlgmr.msrb.gmra.mxu0 %v1082_v37 }
  0x42   :  { %618 = vmatmul.bf16.vlgmr.msrb.gmra.mxu1 %v1086_v38 }
  0x43   :  { %800 = vmatmul.bf16.vlgmr.msrb.gmra.mxu2 %v1202_v39 }
  0x44   :  { %819 = vmatmul.bf16.vlgmr.msrb.gmra.mxu3 %v1206_v40 }
  0x51   :  { %604 = vmatmul.bf16.gmra.mxu0 %v1090_v49 }
  0x52   :  { %623 = vmatmul.bf16.gmra.mxu1 %v1094_v50 }
  0x53   :  { %805 = vmatmul.bf16.gmra.mxu2 %v1210_v51 }
  0x54   :  { %824 = vmatmul.bf16.gmra.mxu3 %v1214_v52 }
  0x7c   :  { %v57_v53 = vpop.permute.xlu0 %56 }
  0x7d   :  { %v1693_v5 = vpop.permute.xlu1 %66 }
  0x84   :  { %v1687_v59 = vpop.permute.xlu0 %61 }
  0x85   :  { %v1706_v17 = vpop.permute.xlu1 %71 }
  0x9e   :  { %v199_v54 = vpop.f32.mrf.mxu0 }
  0x9f   :  { %v218_v55 = vpop.f32.mrf.mxu1  ;;  %v200_v56 = vadd.f32 %v199_v54, %v57_v53 }
  0xa1   :  { %v219_v57 = vadd.f32 %v218_v55, %v200_v56 }
  0xa3   :  { %v228_v58 = vmax.f32 %v219_v57, 0.0 }
  0xa5   :  { %232 = vst [vmem:[%s1756_s3] sm:$0xff] %v228_v58 }
  0xa6   :  { %v399_v60 = vpop.f32.mrf.mxu2  ;;  %v201_v63 = vpop.f32.mrf.mxu0 }
  0xa7   :  { %v418_v61 = vpop.f32.mrf.mxu3  ;;  %v400_v62 = vadd.f32 %v399_v60, %v57_v53  ;;  %v220_v0 = vpop.f32.mrf.mxu1  ;;  %v202_v1 = vadd.f32 %v201_v63, %v1687_v59 }
  0xa9   :  { %v419_v2 = vadd.f32 %v418_v61, %v400_v62  ;;  %v221_v3 = vadd.f32 %v220_v0, %v202_v1 }
  0xab   :  { %v428_v4 = vmax.f32 %v419_v2, 0.0  ;;  %v229_v6 = vmax.f32 %v221_v3, 0.0 }
  0xad   :  { %1039 = vst [vmem:[%s1756_s3 + $0x20] sm:$0xff] %v428_v4 }
  0xae   :  { %233 = vst [vmem:[%s1756_s3 + $0x8] sm:$0xff] %v229_v6  ;;  %v401_v7 = vpop.f32.mrf.mxu2  ;;  %v204_v10 = vpop.f32.mrf.mxu0 }
  0xaf   :  { %v420_v8 = vpop.f32.mrf.mxu3  ;;  %v402_v9 = vadd.f32 %v401_v7, %v1687_v59  ;;  %v223_v11 = vpop.f32.mrf.mxu1  ;;  %v205_v12 = vadd.f32 %v204_v10, %v1693_v5 }
  0xb1   :  { %v421_v13 = vadd.f32 %v420_v8, %v402_v9  ;;  %v224_v14 = vadd.f32 %v223_v11, %v205_v12 }
  0xb3   :  { %v429_v15 = vmax.f32 %v421_v13, 0.0  ;;  %v230_v16 = vmax.f32 %v224_v14, 0.0 }
  0xb5   :  { %1040 = vst [vmem:[%s1756_s3 + $0x28] sm:$0xff] %v429_v15 }
  0xb6   :  { %234 = vst [vmem:[%s1756_s3 + $0x10] sm:$0xff] %v230_v16  ;;  %v404_v18 = vpop.f32.mrf.mxu2  ;;  %v206_v21 = vpop.f32.mrf.mxu0 }
  0xb7   :  { %v423_v19 = vpop.f32.mrf.mxu3  ;;  %v405_v20 = vadd.f32 %v404_v18, %v1693_v5  ;;  %v225_v22 = vpop.f32.mrf.mxu1  ;;  %v207_v23 = vadd.f32 %v206_v21, %v1706_v17 }
  0xb9   :  { %v424_v24 = vadd.f32 %v423_v19, %v405_v20  ;;  %v226_v25 = vadd.f32 %v225_v22, %v207_v23 }
  0xbb   :  { %v430_v26 = vmax.f32 %v424_v24, 0.0  ;;  %v231_v27 = vmax.f32 %v226_v25, 0.0 }
  0xbd   :  { %1041 = vst [vmem:[%s1756_s3 + $0x30] sm:$0xff] %v430_v26 }
  0xbe   :  { %235 = vst [vmem:[%s1756_s3 + $0x18] sm:$0xff] %v231_v27  ;;  %v406_v28 = vpop.f32.mrf.mxu2  ;;  %v600_v31 = vpop.f32.mrf.mxu0 }
  0xbf   :  { %v425_v29 = vpop.f32.mrf.mxu3  ;;  %v407_v30 = vadd.f32 %v406_v28, %v1706_v17  ;;  %v601_v32 = vadd.f32 %v600_v31, %v57_v53  ;;  %v619_v33 = vpop.f32.mrf.mxu1 }
  0xc1   :  { %v426_v34 = vadd.f32 %v425_v29, %v407_v30  ;;  %v620_v35 = vadd.f32 %v619_v33, %v601_v32 }
  0xc3   :  { %v431_v36 = vmax.f32 %v426_v34, 0.0  ;;  %v629_v37 = vmax.f32 %v620_v35, 0.0 }
  0xc5   :  { %1042 = vst [vmem:[%s1756_s3 + $0x38] sm:$0xff] %v431_v36 }
  0xc6   :  { %1159 = vst [vmem:[%s1756_s3 + $0x40] sm:$0xff] %v629_v37  ;;  %v801_v38 = vpop.f32.mrf.mxu2  ;;  %v602_v41 = vpop.f32.mrf.mxu0 }
  0xc7   :  { %v802_v39 = vadd.f32 %v801_v38, %v57_v53  ;;  %v820_v40 = vpop.f32.mrf.mxu3  ;;  %v603_v42 = vadd.f32 %v602_v41, %v1687_v59  ;;  %v621_v43 = vpop.f32.mrf.mxu1 }
  0xc9   :  { %v821_v44 = vadd.f32 %v820_v40, %v802_v39  ;;  %v622_v45 = vadd.f32 %v621_v43, %v603_v42 }
  0xcb   :  { %v830_v46 = vmax.f32 %v821_v44, 0.0  ;;  %v630_v47 = vmax.f32 %v622_v45, 0.0 }
  0xcd   :  { %1279 = vst [vmem:[%s1756_s3 + $0x60] sm:$0xff] %v830_v46 }
  0xce   :  { %1160 = vst [vmem:[%s1756_s3 + $0x48] sm:$0xff] %v630_v47  ;;  %v803_v48 = vpop.f32.mrf.mxu2  ;;  %v605_v51 = vpop.f32.mrf.mxu0 }
  0xcf   :  { %v804_v49 = vadd.f32 %v803_v48, %v1687_v59  ;;  %v822_v50 = vpop.f32.mrf.mxu3  ;;  %v606_v52 = vadd.f32 %v605_v51, %v1693_v5  ;;  %v624_v53 = vpop.f32.mrf.mxu1 }
  0xd1   :  { %v823_v54 = vadd.f32 %v822_v50, %v804_v49  ;;  %v625_v55 = vadd.f32 %v624_v53, %v606_v52 }
  0xd3   :  { %v831_v56 = vmax.f32 %v823_v54, 0.0  ;;  %v631_v57 = vmax.f32 %v625_v55, 0.0 }
  0xd5   :  { %1280 = vst [vmem:[%s1756_s3 + $0x68] sm:$0xff] %v831_v56 }
  0xd6   :  { %1161 = vst [vmem:[%s1756_s3 + $0x50] sm:$0xff] %v631_v57  ;;  %v806_v58 = vpop.f32.mrf.mxu2  ;;  %v607_v61 = vpop.f32.mrf.mxu0 }
  0xd7   :  { %v807_v59 = vadd.f32 %v806_v58, %v1693_v5  ;;  %v825_v60 = vpop.f32.mrf.mxu3  ;;  %v608_v62 = vadd.f32 %v607_v61, %v1706_v17  ;;  %v626_v0 = vpop.f32.mrf.mxu1 }
  0xd9   :  { %v826_v63 = vadd.f32 %v825_v60, %v807_v59  ;;  %v627_v1 = vadd.f32 %v626_v0, %v608_v62 }
  0xdb   :  { %v832_v2 = vmax.f32 %v826_v63, 0.0  ;;  %v632_v3 = vmax.f32 %v627_v1, 0.0 }
  0xdd   :  { %1281 = vst [vmem:[%s1756_s3 + $0x70] sm:$0xff] %v832_v2 }
  0xde   :  { %1162 = vst [vmem:[%s1756_s3 + $0x58] sm:$0xff] %v632_v3  ;;  %v808_v4 = vpop.f32.mrf.mxu2 }
  0xdf   :  { %v809_v5 = vadd.f32 %v808_v4, %v1706_v17  ;;  %v827_v6 = vpop.f32.mrf.mxu3 }
  0xe1   :  { %v828_v7 = vadd.f32 %v827_v6, %v809_v5 }
  0xe3   :  { %v833_v8 = vmax.f32 %v828_v7, 0.0 }
  0xe5   :  { %1282 = vst [vmem:[%s1756_s3 + $0x78] sm:$0xff] %v833_v8 }

// kernel: decoder_dv_pallas.7
= control target key start
LH: loop header
LB: loop body
LE: loop exit
PB: predicated region body
PF: predicated region fallthrough
CT: control target
= control target key end

     0   :  { %s891_s0 = inlined_call_operand.vmem [shape: f32[192,32], index: 0, kind: input, shape index: {}]   ;;  %s892_s1 = inlined_call_operand.vmem [shape: f32[32,40], index: 1, kind: input, shape index: {}]   ;;  %s893_s2 = inlined_call_operand.vmem [shape: f32[40,32], index: 2, kind: input, shape index: {}]   ;;  %s894_s3 = inlined_call_operand.hbm [shape: f32[6,40,40], index: 3, kind: output, shape index: {}]  }
   0x1   :  { %v42_v0 = vld [vmem:[%s892_s1 + $0x18] sm:$0xff]  ;;  %v41_v1 = vld [vmem:[%s892_s1 + $0x10] sm:$0xff]  ;;  %v40_v2 = vld [vmem:[%s892_s1 + $0x8] sm:$0xff] }
   0x2   :  { %128 = vmatpush.msra.mxu0 %v42_v0  ;;  %625 = vmatpush.msra.mxu1 %v42_v0 }
   0x3   :  { %626 = vmatpush.msra.mxu3 %v42_v0 }
   0x4   :  { %129 = vmatpush.msra.mxu0 %v41_v1  ;;  %627 = vmatpush.msra.mxu1 %v41_v1 }
   0x5   :  { %8 = vsyncpa [#allocation3], 0  ;;  %v39_v3 = vld [vmem:[%s892_s1] sm:$0xff]  ;;  %628 = vmatpush.msra.mxu3 %v41_v1  ;;  %vm43_vm0 = vcmask 261120   ;;  %v29_v5 = vld [vmem:[%s891_s0 + $0x70] sm:$0xff]  ;;  %vm257_vm1 = vcmask 326656  }
   0x6   :  { %130 = vmatpush.msra.mxu0 %v40_v2  ;;  %v15_v4 = vld [vmem:[%s891_s0] sm:$0xff]  ;;  %629 = vmatpush.msra.mxu1 %v40_v2  ;;  %v16_v6 = vld [vmem:[%s891_s0 + $0x8] sm:$0xff]  ;;  %v30_v7 = vld [vmem:[%s891_s0 + $0x78] sm:$0xff]  ;;  %s559_s1 = sshll.u32 %s894_s3, 4  ;;  %s667_s24 = smov 128   ;;  %s560_s1 = int_to_ptr.hbm [resolvable:$true] %s559_s1 }
   0x7   :  { %630 = vmatpush.msra.mxu3 %v40_v2  ;;  %v17_v8 = vld [vmem:[%s891_s0 + $0x10] sm:$0xff]  ;;  %v31_v9 = vld [vmem:[%s891_s0 + $0x80] sm:$0xff]  ;;  %v18_v10 = vld [vmem:[%s891_s0 + $0x18] sm:$0xff]  ;;  %s668_s25 = smov 8  }
   0x8   :  { %131 = vmatpush.msra.mxu0 %v39_v3  ;;  %631 = vmatpush.msra.mxu1 %v39_v3  ;;  %v32_v11 = vld [vmem:[%s891_s0 + $0x88] sm:$0xff]  ;;  %v19_v12 = vld [vmem:[%s891_s0 + $0x20] sm:$0xff]  ;;  %v33_v13 = vld [vmem:[%s891_s0 + $0x90] sm:$0xff] }
   0x9   :  { %571 = vmatmul.msk.f32.vlgmr.msra.gmra.mxu0 %vm43_vm0, %v15_v4  ;;  %585 = vmatmul.msk.f32.vlgmr.msra.gmra.mxu1 %vm43_vm0, %v29_v5  ;;  %v20_v14 = vld [vmem:[%s891_s0 + $0x28] sm:$0xff]  ;;  %v34_v15 = vld [vmem:[%s891_s0 + $0x98] sm:$0xff]  ;;  %v21_v16 = vld [vmem:[%s891_s0 + $0x30] sm:$0xff] }
   0xa   :  { %632 = vmatpush.msra.mxu3 %v39_v3  ;;  %v35_v17 = vld [vmem:[%s891_s0 + $0xa0] sm:$0xff]  ;;  %v22_v18 = vld [vmem:[%s891_s0 + $0x38] sm:$0xff]  ;;  %v36_v19 = vld [vmem:[%s891_s0 + $0xa8] sm:$0xff] }
   0xb   :  { %v38_v20 = vld [vmem:[%s891_s0 + $0xb8] sm:$0xff]  ;;  %v23_v21 = vld [vmem:[%s891_s0 + $0x40] sm:$0xff]  ;;  %v37_v22 = vld [vmem:[%s891_s0 + $0xb0] sm:$0xff] }
   0xc   :  { %594 = vmatmul.msk.f32.vlgmr.msra.gmra.mxu3 %vm43_vm0, %v38_v20  ;;  %v24_v23 = vld [vmem:[%s891_s0 + $0x48] sm:$0xff]  ;;  %v25_v24 = vld [vmem:[%s891_s0 + $0x50] sm:$0xff]  ;;  %v26_v25 = vld [vmem:[%s891_s0 + $0x58] sm:$0xff] }
   0xd   :  { %v27_v26 = vld [vmem:[%s891_s0 + $0x60] sm:$0xff]  ;;  %v28_v27 = vld [vmem:[%s891_s0 + $0x68] sm:$0xff]  ;;  %v207_v40 = vld [vmem:[%s893_s2 + $0x10] sm:$0xff] }
   0xe   :  { %v800_v35 = vld [vmem:[%s893_s2] sm:$0xff]  ;;  %v807_v37 = vld [vmem:[%s893_s2 + $0x8] sm:$0xff]  ;;  %v208_v43 = vld [vmem:[%s893_s2 + $0x18] sm:$0xff] }
   0xf   :  { %v209_v44 = vld [vmem:[%s893_s2 + $0x20] sm:$0xff]  ;;  %s666_s2 = smov [#allocation2]  }
  0x10   :  { %s557_s21 = sshll.u32 %s666_s2, 4  ;;  %s558_s21 = int_to_ptr.vmem [resolvable:$true] %s557_s21 }
  0x11   :  { %572 = vmatmul.msk.f32.gmra.mxu0 %vm43_vm0, %v16_v6  ;;  %586 = vmatmul.msk.f32.gmra.mxu1 %vm43_vm0, %v30_v7 }
  0x19   :  { %573 = vmatmul.msk.f32.gmra.mxu0 %vm43_vm0, %v17_v8  ;;  %587 = vmatmul.msk.f32.gmra.mxu1 %vm43_vm0, %v31_v9 }
  0x21   :  { %574 = vmatmul.msk.f32.gmra.mxu0 %vm43_vm0, %v18_v10  ;;  %588 = vmatmul.msk.f32.gmra.mxu1 %vm43_vm0, %v32_v11 }
  0x29   :  { %575 = vmatmul.msk.f32.gmra.mxu0 %vm43_vm0, %v19_v12  ;;  %589 = vmatmul.msk.f32.gmra.mxu1 %vm43_vm0, %v33_v13 }
  0x31   :  { %576 = vmatmul.msk.f32.gmra.mxu0 %vm43_vm0, %v20_v14  ;;  %590 = vmatmul.msk.f32.gmra.mxu1 %vm43_vm0, %v34_v15 }
  0x39   :  { %577 = vmatmul.msk.f32.gmra.mxu0 %vm43_vm0, %v21_v16  ;;  %591 = vmatmul.msk.f32.gmra.mxu1 %vm43_vm0, %v35_v17 }
  0x41   :  { %578 = vmatmul.msk.f32.gmra.mxu0 %vm43_vm0, %v22_v18  ;;  %592 = vmatmul.msk.f32.gmra.mxu1 %vm43_vm0, %v36_v19 }
  0x49   :  { %579 = vmatmul.msk.f32.gmra.mxu0 %vm43_vm0, %v23_v21  ;;  %593 = vmatmul.msk.f32.gmra.mxu1 %vm43_vm0, %v37_v22 }
  0x51   :  { %580 = vmatmul.msk.f32.gmra.mxu0 %vm43_vm0, %v24_v23 }
  0x59   :  { %581 = vmatmul.msk.f32.gmra.mxu0 %vm43_vm0, %v25_v24 }
  0x61   :  { %582 = vmatmul.msk.f32.gmra.mxu0 %vm43_vm0, %v26_v25 }
  0x69   :  { %583 = vmatmul.msk.f32.gmra.mxu0 %vm43_vm0, %v27_v26 }
  0x71   :  { %584 = vmatmul.msk.f32.gmra.mxu0 %vm43_vm0, %v28_v27 }
  0x86   :  { %v133_v28 = vpop.f32.mrf.mxu0  ;;  %v175_v29 = vpop.f32.mrf.mxu1 }
  0x8e   :  { %v136_v30 = vpop.f32.mrf.mxu0  ;;  %v178_v31 = vpop.f32.mrf.mxu1 }
  0x8f   :  { %411 = vmatpush.msrb.mxu1 %v178_v31  ;;  %v202_v53 = vpop.f32.mrf.mxu3 }
  0x91   :  { %412 = vmatpush.msrb.mxu1 %v175_v29 }
  0x96   :  { %v139_v32 = vpop.f32.mrf.mxu0  ;;  %v181_v34 = vpop.f32.mrf.mxu1 }
  0x9e   :  { %v142_v33 = vpop.f32.mrf.mxu0  ;;  %v184_v39 = vpop.f32.mrf.mxu1 }
  0x9f   :  { %237 = vmatpush.msra.mxu2 %v142_v33  ;;  %633 = vmatpush.msrb.mxu3 %v142_v33 }
  0xa1   :  { %238 = vmatpush.msra.mxu2 %v139_v32  ;;  %634 = vmatpush.msrb.mxu3 %v139_v32 }
  0xa3   :  { %239 = vmatpush.msra.mxu2 %v136_v30  ;;  %635 = vmatpush.msrb.mxu3 %v136_v30 }
  0xa5   :  { %240 = vmatpush.msra.mxu2 %v133_v28  ;;  %636 = vmatpush.msrb.mxu3 %v133_v28 }
  0xa6   :  { %v145_v36 = vpop.f32.mrf.mxu0  ;;  %595 = vmatmul.msk.f32.vlgmr.msra.gmra.mxu2 %vm43_vm0, %v800_v35  ;;  %v187_v42 = vpop.f32.mrf.mxu1  ;;  %599 = vmatmul.msk.f32.vlgmr.msrb.gmra.mxu3 %vm43_vm0, %v209_v44 }
  0xae   :  { %v148_v38 = vpop.f32.mrf.mxu0  ;;  %596 = vmatmul.msk.f32.gmra.mxu2 %vm43_vm0, %v807_v37  ;;  %v190_v46 = vpop.f32.mrf.mxu1 }
  0xb6   :  { %v151_v41 = vpop.f32.mrf.mxu0  ;;  %597 = vmatmul.msk.f32.gmra.mxu2 %vm43_vm0, %v207_v40  ;;  %v193_v49 = vpop.f32.mrf.mxu1 }
  0xbe   :  { %v154_v45 = vpop.f32.mrf.mxu0  ;;  %598 = vmatmul.msk.f32.gmra.mxu2 %vm43_vm0, %v208_v43  ;;  %v196_v51 = vpop.f32.mrf.mxu1 }
  0xbf   :  { %295 = vmatpush.msrb.mxu2 %v154_v45 }
  0xc1   :  { %296 = vmatpush.msrb.mxu2 %v151_v41 }
  0xc3   :  { %297 = vmatpush.msrb.mxu2 %v148_v38 }
  0xc5   :  { %298 = vmatpush.msrb.mxu2 %v145_v36 }
  0xc6   :  { %v157_v47 = vpop.f32.mrf.mxu0  ;;  %600 = vmatmul.msk.f32.vlgmr.msrb.gmra.mxu2 %vm43_vm0, %v800_v35  ;;  %v199_v54 = vpop.f32.mrf.mxu1 }
  0xc7   :  { %469 = vmatpush.msra.mxu2 %v190_v46 }
  0xc9   :  { %470 = vmatpush.msra.mxu2 %v187_v42 }
  0xcb   :  { %471 = vmatpush.msra.mxu2 %v184_v39 }
  0xcd   :  { %472 = vmatpush.msra.mxu2 %v181_v34 }
  0xce   :  { %v160_v48 = vpop.f32.mrf.mxu0  ;;  %601 = vmatmul.msk.f32.gmra.mxu2 %vm43_vm0, %v807_v37 }
  0xd6   :  { %v163_v50 = vpop.f32.mrf.mxu0  ;;  %602 = vmatmul.msk.f32.gmra.mxu2 %vm43_vm0, %v207_v40 }
  0xde   :  { %v166_v52 = vpop.f32.mrf.mxu0  ;;  %603 = vmatmul.msk.f32.gmra.mxu2 %vm43_vm0, %v208_v43 }
  0xdf   :  { %353 = vmatpush.msra.mxu3 %v166_v52 }
  0xe1   :  { %354 = vmatpush.msra.mxu3 %v163_v50 }
  0xe3   :  { %355 = vmatpush.msra.mxu3 %v160_v48 }
  0xe5   :  { %356 = vmatpush.msra.mxu3 %v157_v47 }
  0xe6   :  { %v169_v55 = vpop.f32.mrf.mxu0  ;;  %605 = vmatmul.msk.f32.vlgmr.msra.gmra.mxu3 %vm43_vm0, %v800_v35  ;;  %604 = vmatmul.msk.f32.gmra.mxu2 %vm43_vm0, %v209_v44 }
  0xe7   :  { %527 = vmatpush.msrb.mxu3 %v202_v53 }
  0xe9   :  { %528 = vmatpush.msrb.mxu3 %v199_v54 }
  0xeb   :  { %529 = vmatpush.msrb.mxu3 %v196_v51 }
  0xed   :  { %530 = vmatpush.msrb.mxu3 %v193_v49 }
  0xee   :  { %v172_v56 = vpop.f32.mrf.mxu0  ;;  %606 = vmatmul.msk.f32.gmra.mxu3 %vm43_vm0, %v807_v37  ;;  %615 = vmatmul.msk.f32.vlgmr.msra.gmra.mxu2 %vm43_vm0, %v800_v35 }
  0xef   :  { %413 = vmatpush.msrb.mxu1 %v172_v56 }
  0xf1   :  { %414 = vmatpush.msrb.mxu1 %v169_v55 }
  0xf2   :  { %610 = vmatmul.msk.f32.vlgmr.msrb.gmra.mxu1 %vm43_vm0, %v800_v35 }
  0xf6   :  { %607 = vmatmul.msk.f32.gmra.mxu3 %vm43_vm0, %v207_v40  ;;  %616 = vmatmul.msk.f32.gmra.mxu2 %vm43_vm0, %v807_v37 }
  0xfa   :  { %611 = vmatmul.msk.f32.gmra.mxu1 %vm43_vm0, %v807_v37 }
  0xfe   :  { %608 = vmatmul.msk.f32.gmra.mxu3 %vm43_vm0, %v208_v43  ;;  %617 = vmatmul.msk.f32.gmra.mxu2 %vm43_vm0, %v207_v40 }
 0x102   :  { %612 = vmatmul.msk.f32.gmra.mxu1 %vm43_vm0, %v207_v40 }
 0x106   :  { %609 = vmatmul.msk.f32.gmra.mxu3 %vm43_vm0, %v209_v44  ;;  %618 = vmatmul.msk.f32.gmra.mxu2 %vm43_vm0, %v208_v43 }
 0x10a   :  { %613 = vmatmul.msk.f32.gmra.mxu1 %vm43_vm0, %v208_v43 }
 0x10e   :  { %620 = vmatmul.msk.f32.vlgmr.msrb.gmra.mxu3 %vm43_vm0, %v800_v35  ;;  %619 = vmatmul.msk.f32.gmra.mxu2 %vm43_vm0, %v209_v44 }
 0x112   :  { %614 = vmatmul.msk.f32.gmra.mxu1 %vm43_vm0, %v209_v44 }
 0x116   :  { %621 = vmatmul.msk.f32.gmra.mxu3 %vm43_vm0, %v807_v37 }
 0x11e   :  { %622 = vmatmul.msk.f32.gmra.mxu3 %vm43_vm0, %v207_v40 }
 0x126   :  { %623 = vmatmul.msk.f32.gmra.mxu3 %vm43_vm0, %v208_v43 }
 0x129   :  { %v242_v57 = vpop.f32.mrf.mxu2  ;;  %v254_v61 = vpop.f32.mrf.mxu3 }
 0x12a   :  { %258 = vst.msk [vmem:[#allocation2] sm:$0xff] %vm257_vm1, %v242_v57 }
 0x12b   :  { %262 = vst.msk [vmem:[#allocation2 + $0x20] sm:$0xff] %vm257_vm1, %v254_v61 }
 0x12e   :  { %624 = vmatmul.msk.f32.gmra.mxu3 %vm43_vm0, %v209_v44 }
 0x131   :  { %v245_v58 = vpop.f32.mrf.mxu2 }
 0x132   :  { %259 = vst.msk [vmem:[#allocation2 + $0x8] sm:$0xff] %vm257_vm1, %v245_v58 }
 0x139   :  { %v248_v59 = vpop.f32.mrf.mxu2 }
 0x13a   :  { %260 = vst.msk [vmem:[#allocation2 + $0x10] sm:$0xff] %vm257_vm1, %v248_v59 }
 0x141   :  { %v251_v60 = vpop.f32.mrf.mxu2 }
 0x142   :  { %261 = vst.msk [vmem:[#allocation2 + $0x18] sm:$0xff] %vm257_vm1, %v251_v60 }
 0x149   :  { %v300_v62 = vpop.f32.mrf.mxu2 }
 0x14a   :  { %316 = vst.msk [vmem:[#allocation2 + $0x28] sm:$0xff] %vm257_vm1, %v300_v62 }
 0x151   :  { %v303_v63 = vpop.f32.mrf.mxu2 }
 0x152   :  { %317 = vst.msk [vmem:[#allocation2 + $0x30] sm:$0xff] %vm257_vm1, %v303_v63 }
 0x159   :  { %v306_v0 = vpop.f32.mrf.mxu2 }
 0x15a   :  { %318 = vst.msk [vmem:[#allocation2 + $0x38] sm:$0xff] %vm257_vm1, %v306_v0 }
 0x161   :  { %v309_v1 = vpop.f32.mrf.mxu2 }
 0x162   :  { %319 = vst.msk [vmem:[#allocation2 + $0x40] sm:$0xff] %vm257_vm1, %v309_v1 }
 0x169   :  { %v358_v2 = vpop.f32.mrf.mxu3  ;;  %v312_v3 = vpop.f32.mrf.mxu2 }
 0x16a   :  { %374 = vst.msk [vmem:[#allocation2 + $0x50] sm:$0xff] %vm257_vm1, %v358_v2 }
 0x16b   :  { %320 = vst.msk [vmem:[#allocation2 + $0x48] sm:$0xff] %vm257_vm1, %v312_v3 }
 0x16f   :  { %v416_v4 = vpop.f32.mrf.mxu1 }
 0x170   :  { %432 = vst.msk [vmem:[#allocation2 + $0x78] sm:$0xff] %vm257_vm1, %v416_v4 }
 0x171   :  { %v361_v5 = vpop.f32.mrf.mxu3  ;;  %v474_v6 = vpop.f32.mrf.mxu2 }
 0x172   :  { %375 = vst.msk [vmem:[#allocation2 + $0x58] sm:$0xff] %vm257_vm1, %v361_v5 }
 0x173   :  { %490 = vst.msk [vmem:[#allocation2 + $0xa0] sm:$0xff] %vm257_vm1, %v474_v6 }
 0x177   :  { %v419_v7 = vpop.f32.mrf.mxu1 }
 0x178   :  { %433 = vst.msk [vmem:[#allocation2 + $0x80] sm:$0xff] %vm257_vm1, %v419_v7 }
 0x179   :  { %v364_v8 = vpop.f32.mrf.mxu3  ;;  %v477_v9 = vpop.f32.mrf.mxu2 }
 0x17a   :  { %376 = vst.msk [vmem:[#allocation2 + $0x60] sm:$0xff] %vm257_vm1, %v364_v8 }
 0x17b   :  { %491 = vst.msk [vmem:[#allocation2 + $0xa8] sm:$0xff] %vm257_vm1, %v477_v9 }
 0x17f   :  { %v422_v10 = vpop.f32.mrf.mxu1 }
 0x180   :  { %434 = vst.msk [vmem:[#allocation2 + $0x88] sm:$0xff] %vm257_vm1, %v422_v10 }
 0x181   :  { %v367_v11 = vpop.f32.mrf.mxu3  ;;  %v480_v12 = vpop.f32.mrf.mxu2 }
 0x182   :  { %377 = vst.msk [vmem:[#allocation2 + $0x68] sm:$0xff] %vm257_vm1, %v367_v11 }
 0x183   :  { %492 = vst.msk [vmem:[#allocation2 + $0xb0] sm:$0xff] %vm257_vm1, %v480_v12 }
 0x187   :  { %v425_v13 = vpop.f32.mrf.mxu1 }
 0x188   :  { %435 = vst.msk [vmem:[#allocation2 + $0x90] sm:$0xff] %vm257_vm1, %v425_v13 }
 0x189   :  { %v370_v14 = vpop.f32.mrf.mxu3  ;;  %v483_v15 = vpop.f32.mrf.mxu2 }
 0x18a   :  { %378 = vst.msk [vmem:[#allocation2 + $0x70] sm:$0xff] %vm257_vm1, %v370_v14 }
 0x18b   :  { %493 = vst.msk [vmem:[#allocation2 + $0xb8] sm:$0xff] %vm257_vm1, %v483_v15 }
 0x18f   :  { %v428_v16 = vpop.f32.mrf.mxu1 }
 0x190   :  { %436 = vst.msk [vmem:[#allocation2 + $0x98] sm:$0xff] %vm257_vm1, %v428_v16 }
 0x191   :  { %v532_v17 = vpop.f32.mrf.mxu3  ;;  %v486_v18 = vpop.f32.mrf.mxu2 }
 0x192   :  { %548 = vst.msk [vmem:[#allocation2 + $0xc8] sm:$0xff] %vm257_vm1, %v532_v17 }
 0x193   :  { %494 = vst.msk [vmem:[#allocation2 + $0xc0] sm:$0xff] %vm257_vm1, %v486_v18 }
 0x199   :  { %v535_v19 = vpop.f32.mrf.mxu3 }
 0x19a   :  { %549 = vst.msk [vmem:[#allocation2 + $0xd0] sm:$0xff] %vm257_vm1, %v535_v19 }
 0x1a1   :  { %v538_v20 = vpop.f32.mrf.mxu3 }
 0x1a2   :  { %550 = vst.msk [vmem:[#allocation2 + $0xd8] sm:$0xff] %vm257_vm1, %v538_v20 }
 0x1a9   :  { %v541_v21 = vpop.f32.mrf.mxu3 }
 0x1aa   :  { %551 = vst.msk [vmem:[#allocation2 + $0xe0] sm:$0xff] %vm257_vm1, %v541_v21 }
 0x1b1   :  { %v544_v22 = vpop.f32.mrf.mxu3 }
 0x1b2   :  { %552 = vst.msk [vmem:[#allocation2 + $0xe8] sm:$0xff] %vm257_vm1, %v544_v22 }
 0x1b3   :  { %565 = dma.vmem_to_hbm [thread:$0]  %s558_s21, 3840, %s560_s1, [#allocation3], %s667_s24, %s667_s24, %s668_s25  }
 0x1b4   :  { %664 = dma.done.wait [#allocation3], 3840  }
 0x1b5   :  { %665 = vsyncadd [#allocation3], 4294963456 }
 0x1b6   :  { %570 = vsyncpa [#allocation3], 1 }

// kernel: decoder_dv_pallas.6
= control target key start
LH: loop header
LB: loop body
LE: loop exit
PB: predicated region body
PF: predicated region fallthrough
CT: control target
= control target key end

     0   :  { %vm275_vm0 = vcmask 1043456   ;;  %s2679_s1 = inlined_call_operand.vmem [shape: bf16[4,128,512], index: 1, kind: input, shape index: {}]   ;;  %s2680_s0 = inlined_call_operand.vmem [shape: bf16[4,3,128], index: 0, kind: input, shape index: {}]   ;;  %s2681_s2 = inlined_call_operand.vmem [shape: f32[3,1], index: 2, kind: input, shape index: {}]   ;;  %s2682_s3 = inlined_call_operand.vmem [shape: f32[4,3,512], index: 3, kind: output, shape index: {}]  }
   0x1   :  { %v1192_v0 = vld [vmem:[%s2679_s1 + $0xe0] sm:$0xf]  ;;  %v1725_v1 = vld [vmem:[%s2679_s1 + $0xec] sm:$0xf0]  ;;  %v1723_v2 = vld [vmem:[%s2679_s1 + $0xe4] sm:$0xf] }
   0x2   :  { %v1193_v3 = vor.u32 %v1725_v1, %v1192_v0  ;;  %v1194_v4 = vld [vmem:[%s2679_s1 + $0xf0] sm:$0xf0]  ;;  %v1200_v5 = vld [vmem:[%s2679_s1 + $0xe8] sm:$0xf]  ;;  %v1726_v6 = vld [vmem:[%s2679_s1 + $0xf4] sm:$0xf0] }
   0x3   :  { %v1197_v7 = vor.u32 %v1723_v2, %v1194_v4  ;;  %v1201_v8 = vor.u32 %v1726_v6, %v1200_v5  ;;  %v1724_v9 = vld [vmem:[%s2679_s1 + $0xec] sm:$0xf]  ;;  %v1202_v10 = vld [vmem:[%s2679_s1 + $0xf8] sm:$0xf0]  ;;  %v1176_v11 = vld [vmem:[%s2679_s1 + $0xc0] sm:$0xf] }
   0x4   :  { %213 = vmatpush.bf16.msra.mxu0 %v1193_v3  ;;  %v1205_v12 = vor.u32 %v1724_v9, %v1202_v10  ;;  %v1721_v13 = vld [vmem:[%s2679_s1 + $0xcc] sm:$0xf0]  ;;  %v1719_v14 = vld [vmem:[%s2679_s1 + $0xc4] sm:$0xf]  ;;  %v1178_v15 = vld [vmem:[%s2679_s1 + $0xd0] sm:$0xf0] }
   0x5   :  { %226 = vmatpush.bf16.msra.mxu1 %v1197_v7  ;;  %239 = vmatpush.bf16.msra.mxu2 %v1201_v8  ;;  %v1177_v16 = vor.u32 %v1721_v13, %v1176_v11  ;;  %v1181_v17 = vor.u32 %v1719_v14, %v1178_v15  ;;  %v1184_v18 = vld [vmem:[%s2679_s1 + $0xc8] sm:$0xf]  ;;  %v1722_v19 = vld [vmem:[%s2679_s1 + $0xd4] sm:$0xf0]  ;;  %v1720_v20 = vld [vmem:[%s2679_s1 + $0xcc] sm:$0xf] }
   0x6   :  { %252 = vmatpush.bf16.msra.mxu3 %v1205_v12  ;;  %v1185_v21 = vor.u32 %v1722_v19, %v1184_v18  ;;  %v1186_v22 = vld [vmem:[%s2679_s1 + $0xd8] sm:$0xf0]  ;;  %v1160_v23 = vld [vmem:[%s2679_s1 + $0xa0] sm:$0xf]  ;;  %v1717_v24 = vld [vmem:[%s2679_s1 + $0xac] sm:$0xf0] }
   0x7   :  { %v1189_v25 = vor.u32 %v1720_v20, %v1186_v22  ;;  %v1715_v26 = vld [vmem:[%s2679_s1 + $0xa4] sm:$0xf]  ;;  %v1162_v27 = vld [vmem:[%s2679_s1 + $0xb0] sm:$0xf0]  ;;  %v1168_v28 = vld [vmem:[%s2679_s1 + $0xa8] sm:$0xf]  ;;  %v1161_v29 = vor.u32 %v1717_v24, %v1160_v23 }
   0x8   :  { %214 = vmatpush.bf16.msra.mxu0 %v1177_v16  ;;  %v1718_v30 = vld [vmem:[%s2679_s1 + $0xb4] sm:$0xf0]  ;;  %v1716_v31 = vld [vmem:[%s2679_s1 + $0xac] sm:$0xf]  ;;  %v1170_v32 = vld [vmem:[%s2679_s1 + $0xb8] sm:$0xf0]  ;;  %v1165_v33 = vor.u32 %v1715_v26, %v1162_v27 }
   0x9   :  { %227 = vmatpush.bf16.msra.mxu1 %v1181_v17  ;;  %240 = vmatpush.bf16.msra.mxu2 %v1185_v21  ;;  %v1169_v34 = vor.u32 %v1718_v30, %v1168_v28  ;;  %v1144_v35 = vld [vmem:[%s2679_s1 + $0x80] sm:$0xf]  ;;  %v1713_v36 = vld [vmem:[%s2679_s1 + $0x8c] sm:$0xf0]  ;;  %v1711_v37 = vld [vmem:[%s2679_s1 + $0x84] sm:$0xf]  ;;  %v1173_v38 = vor.u32 %v1716_v31, %v1170_v32 }
   0xa   :  { %253 = vmatpush.bf16.msra.mxu3 %v1189_v25  ;;  %v1146_v39 = vld [vmem:[%s2679_s1 + $0x90] sm:$0xf0]  ;;  %v1152_v40 = vld [vmem:[%s2679_s1 + $0x88] sm:$0xf]  ;;  %v1714_v41 = vld [vmem:[%s2679_s1 + $0x94] sm:$0xf0]  ;;  %v1145_v44 = vor.u32 %v1713_v36, %v1144_v35 }
   0xb   :  { %v1712_v42 = vld [vmem:[%s2679_s1 + $0x8c] sm:$0xf]  ;;  %v1154_v43 = vld [vmem:[%s2679_s1 + $0x98] sm:$0xf0]  ;;  %v1149_v45 = vor.u32 %v1711_v37, %v1146_v39  ;;  %v1153_v46 = vor.u32 %v1714_v41, %v1152_v40  ;;  %v1128_v47 = vld [vmem:[%s2679_s1 + $0x60] sm:$0xf] }
   0xc   :  { %215 = vmatpush.bf16.msra.mxu0 %v1161_v29  ;;  %v1709_v48 = vld [vmem:[%s2679_s1 + $0x6c] sm:$0xf0]  ;;  %v1707_v49 = vld [vmem:[%s2679_s1 + $0x64] sm:$0xf]  ;;  %v1157_v50 = vor.u32 %v1712_v42, %v1154_v43  ;;  %v1130_v51 = vld [vmem:[%s2679_s1 + $0x70] sm:$0xf0] }
   0xd   :  { %228 = vmatpush.bf16.msra.mxu1 %v1165_v33  ;;  %241 = vmatpush.bf16.msra.mxu2 %v1169_v34  ;;  %v1136_v52 = vld [vmem:[%s2679_s1 + $0x68] sm:$0xf]  ;;  %v1710_v53 = vld [vmem:[%s2679_s1 + $0x74] sm:$0xf0]  ;;  %v1708_v54 = vld [vmem:[%s2679_s1 + $0x6c] sm:$0xf]  ;;  %v1129_v56 = vor.u32 %v1709_v48, %v1128_v47  ;;  %v1133_v57 = vor.u32 %v1707_v49, %v1130_v51 }
   0xe   :  { %254 = vmatpush.bf16.msra.mxu3 %v1173_v38  ;;  %v1138_v55 = vld [vmem:[%s2679_s1 + $0x78] sm:$0xf0]  ;;  %v1137_v58 = vor.u32 %v1710_v53, %v1136_v52  ;;  %v1112_v59 = vld [vmem:[%s2679_s1 + $0x40] sm:$0xf]  ;;  %v1705_v60 = vld [vmem:[%s2679_s1 + $0x4c] sm:$0xf0] }
   0xf   :  { %v1703_v61 = vld [vmem:[%s2679_s1 + $0x44] sm:$0xf]  ;;  %v1141_v62 = vor.u32 %v1708_v54, %v1138_v55  ;;  %v1114_v63 = vld [vmem:[%s2679_s1 + $0x50] sm:$0xf0]  ;;  %v1120_v0 = vld [vmem:[%s2679_s1 + $0x48] sm:$0xf]  ;;  %v1113_v4 = vor.u32 %v1705_v60, %v1112_v59 }
  0x10   :  { %216 = vmatpush.bf16.msra.mxu0 %v1145_v44  ;;  %v1706_v1 = vld [vmem:[%s2679_s1 + $0x54] sm:$0xf0]  ;;  %v1704_v2 = vld [vmem:[%s2679_s1 + $0x4c] sm:$0xf]  ;;  %v1122_v3 = vld [vmem:[%s2679_s1 + $0x58] sm:$0xf0]  ;;  %v1117_v5 = vor.u32 %v1703_v61, %v1114_v63 }
  0x11   :  { %229 = vmatpush.bf16.msra.mxu1 %v1149_v45  ;;  %242 = vmatpush.bf16.msra.mxu2 %v1153_v46  ;;  %v1121_v6 = vor.u32 %v1706_v1, %v1120_v0  ;;  %v1096_v7 = vld [vmem:[%s2679_s1 + $0x20] sm:$0xf]  ;;  %v1701_v8 = vld [vmem:[%s2679_s1 + $0x2c] sm:$0xf0]  ;;  %v1699_v9 = vld [vmem:[%s2679_s1 + $0x24] sm:$0xf]  ;;  %v1125_v10 = vor.u32 %v1704_v2, %v1122_v3 }
  0x12   :  { %255 = vmatpush.bf16.msra.mxu3 %v1157_v50  ;;  %v1098_v11 = vld [vmem:[%s2679_s1 + $0x30] sm:$0xf0]  ;;  %v1104_v12 = vld [vmem:[%s2679_s1 + $0x28] sm:$0xf]  ;;  %v1702_v13 = vld [vmem:[%s2679_s1 + $0x34] sm:$0xf0]  ;;  %v1097_v16 = vor.u32 %v1701_v8, %v1096_v7 }
  0x13   :  { %v1700_v14 = vld [vmem:[%s2679_s1 + $0x2c] sm:$0xf]  ;;  %v1106_v15 = vld [vmem:[%s2679_s1 + $0x38] sm:$0xf0]  ;;  %v1080_v17 = vld [vmem:[%s2679_s1] sm:$0xf]  ;;  %v1101_v19 = vor.u32 %v1699_v9, %v1098_v11  ;;  %v1105_v20 = vor.u32 %v1702_v13, %v1104_v12 }
  0x14   :  { %217 = vmatpush.bf16.msra.mxu0 %v1129_v56  ;;  %v1697_v18 = vld [vmem:[%s2679_s1 + $0xc] sm:$0xf0]  ;;  %v1695_v21 = vld [vmem:[%s2679_s1 + $0x4] sm:$0xf]  ;;  %v1082_v22 = vld [vmem:[%s2679_s1 + $0x10] sm:$0xf0]  ;;  %v1109_v24 = vor.u32 %v1700_v14, %v1106_v15 }
  0x15   :  { %230 = vmatpush.bf16.msra.mxu1 %v1133_v57  ;;  %243 = vmatpush.bf16.msra.mxu2 %v1137_v58  ;;  %v1088_v23 = vld [vmem:[%s2679_s1 + $0x8] sm:$0xf]  ;;  %v1698_v25 = vld [vmem:[%s2679_s1 + $0x14] sm:$0xf0]  ;;  %v1696_v26 = vld [vmem:[%s2679_s1 + $0xc] sm:$0xf]  ;;  %v1081_v31 = vor.u32 %v1697_v18, %v1080_v17  ;;  %v1085_v35 = vor.u32 %v1695_v21, %v1082_v22 }
  0x16   :  { %256 = vmatpush.bf16.msra.mxu3 %v1141_v62  ;;  %v1090_v27 = vld [vmem:[%s2679_s1 + $0x18] sm:$0xf0]  ;;  %v1353_v28 = vld [vmem:[%s2679_s1 + $0x1e0] sm:$0xf]  ;;  %v1757_v29 = vld [vmem:[%s2679_s1 + $0x1ec] sm:$0xf0]  ;;  %v1089_v36 = vor.u32 %v1698_v25, %v1088_v23 }
  0x17   :  { %v1755_v30 = vld [vmem:[%s2679_s1 + $0x1e4] sm:$0xf]  ;;  %v1355_v32 = vld [vmem:[%s2679_s1 + $0x1f0] sm:$0xf0]  ;;  %v1361_v33 = vld [vmem:[%s2679_s1 + $0x1e8] sm:$0xf]  ;;  %v1093_v39 = vor.u32 %v1696_v26, %v1090_v27  ;;  %v1354_v40 = vor.u32 %v1757_v29, %v1353_v28 }
  0x18   :  { %218 = vmatpush.bf16.msra.mxu0 %v1113_v4  ;;  %v1758_v34 = vld [vmem:[%s2679_s1 + $0x1f4] sm:$0xf0]  ;;  %v1756_v37 = vld [vmem:[%s2679_s1 + $0x1ec] sm:$0xf]  ;;  %v1363_v38 = vld [vmem:[%s2679_s1 + $0x1f8] sm:$0xf0]  ;;  %v1358_v41 = vor.u32 %v1755_v30, %v1355_v32 }
  0x19   :  { %231 = vmatpush.bf16.msra.mxu1 %v1117_v5  ;;  %244 = vmatpush.bf16.msra.mxu2 %v1121_v6  ;;  %v1362_v42 = vor.u32 %v1758_v34, %v1361_v33  ;;  %v1337_v43 = vld [vmem:[%s2679_s1 + $0x1c0] sm:$0xf]  ;;  %v1753_v44 = vld [vmem:[%s2679_s1 + $0x1cc] sm:$0xf0]  ;;  %v1751_v45 = vld [vmem:[%s2679_s1 + $0x1c4] sm:$0xf]  ;;  %v1366_v46 = vor.u32 %v1756_v37, %v1363_v38 }
  0x1a   :  { %257 = vmatpush.bf16.msra.mxu3 %v1125_v10  ;;  %v1339_v47 = vld [vmem:[%s2679_s1 + $0x1d0] sm:$0xf0]  ;;  %v1345_v48 = vld [vmem:[%s2679_s1 + $0x1c8] sm:$0xf]  ;;  %v1754_v49 = vld [vmem:[%s2679_s1 + $0x1d4] sm:$0xf0]  ;;  %v1338_v52 = vor.u32 %v1753_v44, %v1337_v43 }
  0x1b   :  { %v1752_v50 = vld [vmem:[%s2679_s1 + $0x1cc] sm:$0xf]  ;;  %v1347_v51 = vld [vmem:[%s2679_s1 + $0x1d8] sm:$0xf0]  ;;  %v1342_v53 = vor.u32 %v1751_v45, %v1339_v47  ;;  %v1346_v54 = vor.u32 %v1754_v49, %v1345_v48  ;;  %v1321_v55 = vld [vmem:[%s2679_s1 + $0x1a0] sm:$0xf] }
  0x1c   :  { %219 = vmatpush.bf16.msra.mxu0 %v1097_v16  ;;  %v1749_v56 = vld [vmem:[%s2679_s1 + $0x1ac] sm:$0xf0]  ;;  %v1747_v57 = vld [vmem:[%s2679_s1 + $0x1a4] sm:$0xf]  ;;  %v1350_v58 = vor.u32 %v1752_v50, %v1347_v51  ;;  %v1323_v59 = vld [vmem:[%s2679_s1 + $0x1b0] sm:$0xf0] }
  0x1d   :  { %232 = vmatpush.bf16.msra.mxu1 %v1101_v19  ;;  %245 = vmatpush.bf16.msra.mxu2 %v1105_v20  ;;  %v1329_v60 = vld [vmem:[%s2679_s1 + $0x1a8] sm:$0xf]  ;;  %v1750_v61 = vld [vmem:[%s2679_s1 + $0x1b4] sm:$0xf0]  ;;  %v1748_v62 = vld [vmem:[%s2679_s1 + $0x1ac] sm:$0xf]  ;;  %v1322_v0 = vor.u32 %v1749_v56, %v1321_v55  ;;  %v1326_v2 = vor.u32 %v1747_v57, %v1323_v59 }
  0x1e   :  { %258 = vmatpush.bf16.msra.mxu3 %v1109_v24  ;;  %v1331_v63 = vld [vmem:[%s2679_s1 + $0x1b8] sm:$0xf0]  ;;  %v15_v1 = vld [vmem:[%s2680_s0] sm:$0x3]  ;;  %v1330_v3 = vor.u32 %v1750_v61, %v1329_v60  ;;  %v1745_v5 = vld [vmem:[%s2679_s1 + $0x18c] sm:$0xf0] }
  0x1f   :  { %v1305_v4 = vld [vmem:[%s2679_s1 + $0x180] sm:$0xf]  ;;  %v1743_v6 = vld [vmem:[%s2679_s1 + $0x184] sm:$0xf]  ;;  %v1334_v7 = vor.u32 %v1748_v62, %v1331_v63  ;;  %v1307_v8 = vld [vmem:[%s2679_s1 + $0x190] sm:$0xf0] }
  0x20   :  { %220 = vmatpush.bf16.msra.mxu0 %v1081_v31  ;;  %v1313_v9 = vld [vmem:[%s2679_s1 + $0x188] sm:$0xf]  ;;  %v1746_v10 = vld [vmem:[%s2679_s1 + $0x194] sm:$0xf0]  ;;  %v1744_v11 = vld [vmem:[%s2679_s1 + $0x18c] sm:$0xf]  ;;  %v1306_v13 = vor.u32 %v1745_v5, %v1305_v4  ;;  %v1310_v14 = vor.u32 %v1743_v6, %v1307_v8 }
  0x21   :  { %233 = vmatpush.bf16.msra.mxu1 %v1085_v35  ;;  %246 = vmatpush.bf16.msra.mxu2 %v1089_v36  ;;  %v1315_v12 = vld [vmem:[%s2679_s1 + $0x198] sm:$0xf0]  ;;  %v1314_v15 = vor.u32 %v1746_v10, %v1313_v9  ;;  %v1289_v16 = vld [vmem:[%s2679_s1 + $0x160] sm:$0xf]  ;;  %v1741_v17 = vld [vmem:[%s2679_s1 + $0x16c] sm:$0xf0] }
  0x22   :  { %259 = vmatpush.bf16.msra.mxu3 %v1093_v39  ;;  %v1739_v18 = vld [vmem:[%s2679_s1 + $0x164] sm:$0xf]  ;;  %v1318_v19 = vor.u32 %v1744_v11, %v1315_v12  ;;  %v1291_v20 = vld [vmem:[%s2679_s1 + $0x170] sm:$0xf0]  ;;  %v1297_v21 = vld [vmem:[%s2679_s1 + $0x168] sm:$0xf]  ;;  %v1290_v25 = vor.u32 %v1741_v17, %v1289_v16 }
  0x23   :  { %221 = vmatmul.bf16.vlgmr.msra.gmra.mxu0 %v15_v1  ;;  %v1742_v22 = vld [vmem:[%s2679_s1 + $0x174] sm:$0xf0]  ;;  %v1740_v23 = vld [vmem:[%s2679_s1 + $0x16c] sm:$0xf]  ;;  %v1299_v24 = vld [vmem:[%s2679_s1 + $0x178] sm:$0xf0]  ;;  %v1294_v26 = vor.u32 %v1739_v18, %v1291_v20 }
  0x24   :  { %477 = vmatpush.bf16.msrb.mxu0 %v1354_v40  ;;  %247 = vmatmul.bf16.vlgmr.msra.gmra.mxu2 %v15_v1  ;;  %v1298_v27 = vor.u32 %v1742_v22, %v1297_v21  ;;  %v1273_v28 = vld [vmem:[%s2679_s1 + $0x140] sm:$0xf]  ;;  %v1737_v29 = vld [vmem:[%s2679_s1 + $0x14c] sm:$0xf0]  ;;  %v1735_v30 = vld [vmem:[%s2679_s1 + $0x144] sm:$0xf]  ;;  %v1302_v31 = vor.u32 %v1740_v23, %v1299_v24 }
  0x25   :  { %490 = vmatpush.bf16.msrb.mxu1 %v1358_v41  ;;  %503 = vmatpush.bf16.msrb.mxu2 %v1362_v42  ;;  %v1275_v32 = vld [vmem:[%s2679_s1 + $0x150] sm:$0xf0]  ;;  %v1281_v33 = vld [vmem:[%s2679_s1 + $0x148] sm:$0xf]  ;;  %v1738_v34 = vld [vmem:[%s2679_s1 + $0x154] sm:$0xf0]  ;;  %v1274_v37 = vor.u32 %v1737_v29, %v1273_v28 }
  0x26   :  { %516 = vmatpush.bf16.msrb.mxu3 %v1366_v46  ;;  %234 = vmatmul.bf16.vlgmr.msra.gmra.mxu1 %v15_v1  ;;  %v1736_v35 = vld [vmem:[%s2679_s1 + $0x14c] sm:$0xf]  ;;  %v1283_v36 = vld [vmem:[%s2679_s1 + $0x158] sm:$0xf0]  ;;  %v1278_v38 = vor.u32 %v1735_v30, %v1275_v32  ;;  %v1282_v39 = vor.u32 %v1738_v34, %v1281_v33  ;;  %v1257_v40 = vld [vmem:[%s2679_s1 + $0x120] sm:$0xf] }
  0x27   :  { %260 = vmatmul.bf16.vlgmr.msra.gmra.mxu3 %v15_v1  ;;  %v1733_v41 = vld [vmem:[%s2679_s1 + $0x12c] sm:$0xf0]  ;;  %v1731_v42 = vld [vmem:[%s2679_s1 + $0x124] sm:$0xf]  ;;  %v1286_v43 = vor.u32 %v1736_v35, %v1283_v36  ;;  %v1259_v44 = vld [vmem:[%s2679_s1 + $0x130] sm:$0xf0] }
  0x28   :  { %478 = vmatpush.bf16.msrb.mxu0 %v1338_v52  ;;  %v1265_v45 = vld [vmem:[%s2679_s1 + $0x128] sm:$0xf]  ;;  %v1734_v46 = vld [vmem:[%s2679_s1 + $0x134] sm:$0xf0]  ;;  %v1732_v47 = vld [vmem:[%s2679_s1 + $0x12c] sm:$0xf]  ;;  %v1258_v50 = vor.u32 %v1733_v41, %v1257_v40 }
  0x29   :  { %491 = vmatpush.bf16.msrb.mxu1 %v1342_v53  ;;  %504 = vmatpush.bf16.msrb.mxu2 %v1346_v54  ;;  %v1267_v48 = vld [vmem:[%s2679_s1 + $0x138] sm:$0xf0]  ;;  %v1241_v49 = vld [vmem:[%s2679_s1 + $0x100] sm:$0xf]  ;;  %v1729_v51 = vld [vmem:[%s2679_s1 + $0x10c] sm:$0xf0]  ;;  %v1262_v53 = vor.u32 %v1731_v42, %v1259_v44  ;;  %v1266_v54 = vor.u32 %v1734_v46, %v1265_v45 }
  0x2a   :  { %517 = vmatpush.bf16.msrb.mxu3 %v1350_v58  ;;  %v1727_v52 = vld [vmem:[%s2679_s1 + $0x104] sm:$0xf]  ;;  %v1243_v55 = vld [vmem:[%s2679_s1 + $0x110] sm:$0xf0]  ;;  %v1249_v56 = vld [vmem:[%s2679_s1 + $0x108] sm:$0xf]  ;;  %v1270_v58 = vor.u32 %v1732_v47, %v1267_v48 }
  0x2b   :  { %v14_v57 = vld [vmem:[%s2681_s2] sm:$0x7]  ;;  %v1730_v59 = vld [vmem:[%s2679_s1 + $0x114] sm:$0xf0]  ;;  %v1728_v60 = vld [vmem:[%s2679_s1 + $0x10c] sm:$0xf]  ;;  %v1246_v6 = vor.u32 %v1727_v52, %v1243_v55 }
  0x2c   :  { %479 = vmatpush.bf16.msrb.mxu0 %v1322_v0  ;;  %v1251_v61 = vld [vmem:[%s2679_s1 + $0x118] sm:$0xf0]  ;;  %v1825_v62 = vmov 0   ;;  %v1516_v63 = vld [vmem:[%s2679_s1 + $0x2e0] sm:$0xf] }
  0x2d   :  { %492 = vmatpush.bf16.msrb.mxu1 %v1326_v2  ;;  %505 = vmatpush.bf16.msrb.mxu2 %v1330_v3  ;;  %v1789_v0 = vld [vmem:[%s2679_s1 + $0x2ec] sm:$0xf0]  ;;  %v1787_v1 = vld [vmem:[%s2679_s1 + $0x2e4] sm:$0xf]  ;;  %v1242_v2 = vor.u32 %v1729_v51, %v1241_v49  ;;  %v1518_v3 = vld [vmem:[%s2679_s1 + $0x2f0] sm:$0xf0]  ;;  %v1254_v10 = vor.u32 %v1728_v60, %v1251_v61 }
  0x2e   :  { %518 = vmatpush.bf16.msrb.mxu3 %v1334_v7  ;;  %1824 = vset.pattern.permute.xlu0 %v1825_v62  ;;  %v1524_v4 = vld [vmem:[%s2679_s1 + $0x2e8] sm:$0xf]  ;;  %v1790_v5 = vld [vmem:[%s2679_s1 + $0x2f4] sm:$0xf0]  ;;  %v1250_v7 = vor.u32 %v1730_v59, %v1249_v56  ;;  %v1788_v8 = vld [vmem:[%s2679_s1 + $0x2ec] sm:$0xf]  ;;  %v1517_v11 = vor.u32 %v1789_v0, %v1516_v63  ;;  %v1521_v12 = vor.u32 %v1787_v1, %v1518_v3 }
  0x2f   :  { %50 = vperm.xlu0 %1824, %v14_v57   ;;  %v1526_v9 = vld [vmem:[%s2679_s1 + $0x2f8] sm:$0xf0]  ;;  %v1783_v16 = vld [vmem:[%s2679_s1 + $0x2c4] sm:$0xf]  ;;  %v1502_v18 = vld [vmem:[%s2679_s1 + $0x2d0] sm:$0xf0] }
  0x30   :  { %480 = vmatpush.bf16.msrb.mxu0 %v1306_v13  ;;  %v1525_v13 = vor.u32 %v1790_v5, %v1524_v4  ;;  %v1529_v17 = vor.u32 %v1788_v8, %v1526_v9  ;;  %v1786_v20 = vld [vmem:[%s2679_s1 + $0x2d4] sm:$0xf0]  ;;  %v1784_v21 = vld [vmem:[%s2679_s1 + $0x2cc] sm:$0xf]  ;;  %v1510_v22 = vld [vmem:[%s2679_s1 + $0x2d8] sm:$0xf0] }
  0x31   :  { %493 = vmatpush.bf16.msrb.mxu1 %v1310_v14  ;;  %506 = vmatpush.bf16.msrb.mxu2 %v1314_v15  ;;  %v1500_v14 = vld [vmem:[%s2679_s1 + $0x2c0] sm:$0xf]  ;;  %v1785_v15 = vld [vmem:[%s2679_s1 + $0x2cc] sm:$0xf0]  ;;  %v1779_v29 = vld [vmem:[%s2679_s1 + $0x2a4] sm:$0xf]  ;;  %v1513_v30 = vor.u32 %v1784_v21, %v1510_v22 }
  0x32   :  { %519 = vmatpush.bf16.msrb.mxu3 %v1318_v19  ;;  %v1508_v19 = vld [vmem:[%s2679_s1 + $0x2c8] sm:$0xf]  ;;  %v1206_v23 = vld [vmem:[%s2680_s0 + $0x2] sm:$0x3]  ;;  %v1501_v24 = vor.u32 %v1785_v15, %v1500_v14  ;;  %v1781_v28 = vld [vmem:[%s2679_s1 + $0x2ac] sm:$0xf0] }
  0x33   :  { %v1492_v32 = vld [vmem:[%s2679_s1 + $0x2a8] sm:$0xf]  ;;  %v1782_v33 = vld [vmem:[%s2679_s1 + $0x2b4] sm:$0xf0]  ;;  %v1780_v34 = vld [vmem:[%s2679_s1 + $0x2ac] sm:$0xf] }
  0x34   :  { %481 = vmatpush.bf16.msrb.mxu0 %v1290_v25  ;;  %v1505_v25 = vor.u32 %v1783_v16, %v1502_v18  ;;  %v1494_v35 = vld [vmem:[%s2679_s1 + $0x2b8] sm:$0xf0]  ;;  %v1777_v40 = vld [vmem:[%s2679_s1 + $0x28c] sm:$0xf0]  ;;  %v1775_v41 = vld [vmem:[%s2679_s1 + $0x284] sm:$0xf] }
  0x35   :  { %494 = vmatpush.bf16.msrb.mxu1 %v1294_v26  ;;  %507 = vmatpush.bf16.msrb.mxu2 %v1298_v27  ;;  %v1509_v26 = vor.u32 %v1786_v20, %v1508_v19  ;;  %v1484_v27 = vld [vmem:[%s2679_s1 + $0x2a0] sm:$0xf]  ;;  %v1497_v42 = vor.u32 %v1780_v34, %v1494_v35  ;;  %v1476_v44 = vld [vmem:[%s2679_s1 + $0x288] sm:$0xf]  ;;  %v1778_v45 = vld [vmem:[%s2679_s1 + $0x294] sm:$0xf0] }
  0x36   :  { %520 = vmatpush.bf16.msrb.mxu3 %v1302_v31  ;;  %v1486_v31 = vld [vmem:[%s2679_s1 + $0x2b0] sm:$0xf0]  ;;  %v1485_v36 = vor.u32 %v1781_v28, %v1484_v27  ;;  %v1776_v46 = vld [vmem:[%s2679_s1 + $0x28c] sm:$0xf]  ;;  %v1478_v47 = vld [vmem:[%s2679_s1 + $0x298] sm:$0xf0] }
  0x37   :  { %v1452_v51 = vld [vmem:[%s2679_s1 + $0x260] sm:$0xf]  ;;  %v1773_v52 = vld [vmem:[%s2679_s1 + $0x26c] sm:$0xf0]  ;;  %v1454_v55 = vld [vmem:[%s2679_s1 + $0x270] sm:$0xf0] }
  0x38   :  { %482 = vmatpush.bf16.msrb.mxu0 %v1274_v37  ;;  %v1489_v37 = vor.u32 %v1779_v29, %v1486_v31  ;;  %v1460_v56 = vld [vmem:[%s2679_s1 + $0x268] sm:$0xf]  ;;  %v1774_v57 = vld [vmem:[%s2679_s1 + $0x274] sm:$0xf0]  ;;  %v1462_v59 = vld [vmem:[%s2679_s1 + $0x278] sm:$0xf0]  ;;  %v1453_v60 = vor.u32 %v1773_v52, %v1452_v51 }
  0x39   :  { %495 = vmatpush.bf16.msrb.mxu1 %v1278_v38  ;;  %508 = vmatpush.bf16.msrb.mxu2 %v1282_v39  ;;  %v1493_v38 = vor.u32 %v1782_v33, %v1492_v32  ;;  %v1468_v39 = vld [vmem:[%s2679_s1 + $0x280] sm:$0xf]  ;;  %v1461_v62 = vor.u32 %v1774_v57, %v1460_v56  ;;  %v1769_v0 = vld [vmem:[%s2679_s1 + $0x24c] sm:$0xf0]  ;;  %v1767_v1 = vld [vmem:[%s2679_s1 + $0x244] sm:$0xf] }
  0x3a   :  { %521 = vmatpush.bf16.msrb.mxu3 %v1286_v43  ;;  %v1470_v43 = vld [vmem:[%s2679_s1 + $0x290] sm:$0xf0]  ;;  %v1469_v48 = vor.u32 %v1777_v40, %v1468_v39  ;;  %v1436_v63 = vld [vmem:[%s2679_s1 + $0x240] sm:$0xf]  ;;  %v1444_v4 = vld [vmem:[%s2679_s1 + $0x248] sm:$0xf] }
  0x3b   :  { %v1473_v49 = vor.u32 %v1775_v41, %v1470_v43  ;;  %v1438_v3 = vld [vmem:[%s2679_s1 + $0x250] sm:$0xf0]  ;;  %v1770_v5 = vld [vmem:[%s2679_s1 + $0x254] sm:$0xf0]  ;;  %v1437_v8 = vor.u32 %v1769_v0, %v1436_v63  ;;  %v1428_v16 = vld [vmem:[%s2679_s1 + $0x228] sm:$0xf] }
  0x3c   :  { %483 = vmatpush.bf16.msrb.mxu0 %v1258_v50  ;;  %v1477_v50 = vor.u32 %v1778_v45, %v1476_v44  ;;  %v1441_v9 = vor.u32 %v1767_v1, %v1438_v3  ;;  %v1422_v15 = vld [vmem:[%s2679_s1 + $0x230] sm:$0xf0]  ;;  %v1764_v18 = vld [vmem:[%s2679_s1 + $0x22c] sm:$0xf]  ;;  %v1430_v19 = vld [vmem:[%s2679_s1 + $0x238] sm:$0xf0] }
  0x3d   :  { %496 = vmatpush.bf16.msrb.mxu1 %v1262_v53  ;;  %509 = vmatpush.bf16.msrb.mxu2 %v1266_v54  ;;  %v1771_v53 = vld [vmem:[%s2679_s1 + $0x264] sm:$0xf]  ;;  %v1481_v54 = vor.u32 %v1776_v46, %v1478_v47  ;;  %v1404_v21 = vld [vmem:[%s2679_s1 + $0x200] sm:$0xf]  ;;  %v1761_v22 = vld [vmem:[%s2679_s1 + $0x20c] sm:$0xf0]  ;;  %v1433_v28 = vor.u32 %v1764_v18, %v1430_v19 }
  0x3e   :  { %522 = vmatpush.bf16.msrb.mxu3 %v1270_v58  ;;  %v1772_v58 = vld [vmem:[%s2679_s1 + $0x26c] sm:$0xf]  ;;  %v1457_v61 = vor.u32 %v1771_v53, %v1454_v55  ;;  %v1412_v27 = vld [vmem:[%s2679_s1 + $0x208] sm:$0xf]  ;;  %v1762_v29 = vld [vmem:[%s2679_s1 + $0x214] sm:$0xf0]  ;;  %v1405_v35 = vor.u32 %v1761_v22, %v1404_v21 }
  0x3f   :  { %v1414_v31 = vld [vmem:[%s2679_s1 + $0x218] sm:$0xf0]  ;;  %v1679_v32 = vld [vmem:[%s2679_s1 + $0x3e0] sm:$0xf]  ;;  %v1821_v33 = vld [vmem:[%s2679_s1 + $0x3ec] sm:$0xf0]  ;;  %v1413_v40 = vor.u32 %v1762_v29, %v1412_v27 }
  0x40   :  { %484 = vmatpush.bf16.msrb.mxu0 %v1242_v2  ;;  %v1465_v2 = vor.u32 %v1772_v58, %v1462_v59  ;;  %v1819_v34 = vld [vmem:[%s2679_s1 + $0x3e4] sm:$0xf]  ;;  %v1820_v41 = vld [vmem:[%s2679_s1 + $0x3ec] sm:$0xf]  ;;  %v1680_v44 = vor.u32 %v1821_v33, %v1679_v32  ;;  %v1663_v47 = vld [vmem:[%s2679_s1 + $0x3c0] sm:$0xf] }
  0x41   :  { %497 = vmatpush.bf16.msrb.mxu1 %v1246_v6  ;;  %510 = vmatpush.bf16.msrb.mxu2 %v1250_v7  ;;  %v1768_v6 = vld [vmem:[%s2679_s1 + $0x24c] sm:$0xf]  ;;  %v1446_v7 = vld [vmem:[%s2679_s1 + $0x258] sm:$0xf0]  ;;  %v1665_v51 = vld [vmem:[%s2679_s1 + $0x3d0] sm:$0xf0] }
  0x42   :  { %523 = vmatpush.bf16.msrb.mxu3 %v1254_v10  ;;  %v1445_v10 = vor.u32 %v1770_v5, %v1444_v4  ;;  %v1449_v14 = vor.u32 %v1768_v6, %v1446_v7  ;;  %v1671_v52 = vld [vmem:[%s2679_s1 + $0x3c8] sm:$0xf]  ;;  %v1818_v53 = vld [vmem:[%s2679_s1 + $0x3d4] sm:$0xf0]  ;;  %v1673_v55 = vld [vmem:[%s2679_s1 + $0x3d8] sm:$0xf0] }
  0x43   :  { %485 = vmatmul.bf16.vlgmr.msrb.gmra.mxu0 %v1206_v23  ;;  %v1369_v56 = vld [vmem:[%s2680_s0 + $0x4] sm:$0x3]  ;;  %v1672_v59 = vor.u32 %v1818_v53, %v1671_v52  ;;  %v1649_v0 = vld [vmem:[%s2679_s1 + $0x3b0] sm:$0xf0]  ;;  %v1655_v1 = vld [vmem:[%s2679_s1 + $0x3a8] sm:$0xf] }
  0x44   :  { %741 = vmatpush.bf16.msra.mxu0 %v1517_v11  ;;  %511 = vmatmul.bf16.vlgmr.msrb.gmra.mxu2 %v1206_v23  ;;  %v1420_v11 = vld [vmem:[%s2679_s1 + $0x220] sm:$0xf]  ;;  %v1812_v3 = vld [vmem:[%s2679_s1 + $0x3ac] sm:$0xf]  ;;  %v1657_v4 = vld [vmem:[%s2679_s1 + $0x3b8] sm:$0xf0] }
  0x45   :  { %754 = vmatpush.bf16.msra.mxu1 %v1521_v12  ;;  %767 = vmatpush.bf16.msra.mxu2 %v1525_v13  ;;  %v1765_v12 = vld [vmem:[%s2679_s1 + $0x22c] sm:$0xf0]  ;;  %v1763_v13 = vld [vmem:[%s2679_s1 + $0x224] sm:$0xf]  ;;  %v1804_v27 = vld [vmem:[%s2679_s1 + $0x36c] sm:$0xf] }
  0x46   :  { %780 = vmatpush.bf16.msra.mxu3 %v1529_v17  ;;  %498 = vmatmul.bf16.vlgmr.msrb.gmra.mxu1 %v1206_v23  ;;  %v1766_v17 = vld [vmem:[%s2679_s1 + $0x234] sm:$0xf0]  ;;  %v1421_v20 = vor.u32 %v1765_v12, %v1420_v11  ;;  %v1660_v11 = vor.u32 %v1812_v3, %v1657_v4  ;;  %v1633_v12 = vld [vmem:[%s2679_s1 + $0x390] sm:$0xf0]  ;;  %v1805_v21 = vld [vmem:[%s2679_s1 + $0x36c] sm:$0xf0] }
  0x47   :  { %524 = vmatmul.bf16.vlgmr.msrb.gmra.mxu3 %v1206_v23  ;;  %v1425_v23 = vor.u32 %v1763_v13, %v1422_v15  ;;  %v1639_v13 = vld [vmem:[%s2679_s1 + $0x388] sm:$0xf]  ;;  %v1808_v15 = vld [vmem:[%s2679_s1 + $0x38c] sm:$0xf]  ;;  %v1803_v22 = vld [vmem:[%s2679_s1 + $0x364] sm:$0xf] }
  0x48   :  { %742 = vmatpush.bf16.msra.mxu0 %v1501_v24  ;;  %v1429_v24 = vor.u32 %v1766_v17, %v1428_v16  ;;  %v1641_v16 = vld [vmem:[%s2679_s1 + $0x398] sm:$0xf0]  ;;  %v1599_v32 = vld [vmem:[%s2679_s1 + $0x340] sm:$0xf]  ;;  %v1801_v33 = vld [vmem:[%s2679_s1 + $0x34c] sm:$0xf0] }
  0x49   :  { %755 = vmatpush.bf16.msra.mxu1 %v1505_v25  ;;  %768 = vmatpush.bf16.msra.mxu2 %v1509_v26  ;;  %v1759_v25 = vld [vmem:[%s2679_s1 + $0x204] sm:$0xf]  ;;  %v1406_v26 = vld [vmem:[%s2679_s1 + $0x210] sm:$0xf0]  ;;  %v1593_v52 = vld [vmem:[%s2679_s1 + $0x338] sm:$0xf0] }
  0x4a   :  { %781 = vmatpush.bf16.msra.mxu3 %v1513_v30  ;;  %v1760_v30 = vld [vmem:[%s2679_s1 + $0x20c] sm:$0xf]  ;;  %v1409_v39 = vor.u32 %v1759_v25, %v1406_v26  ;;  %v1623_v25 = vld [vmem:[%s2679_s1 + $0x368] sm:$0xf]  ;;  %v1806_v26 = vld [vmem:[%s2679_s1 + $0x374] sm:$0xf0] }
  0x4b   :  { %v1417_v43 = vor.u32 %v1760_v30, %v1414_v31  ;;  %v1624_v31 = vor.u32 %v1806_v26, %v1623_v25 }
  0x4c   :  { %743 = vmatpush.bf16.msra.mxu0 %v1485_v36  ;;  %v1681_v36 = vld [vmem:[%s2679_s1 + $0x3f0] sm:$0xf0] }
  0x4d   :  { %756 = vmatpush.bf16.msra.mxu1 %v1489_v37  ;;  %769 = vmatpush.bf16.msra.mxu2 %v1493_v38  ;;  %v1687_v37 = vld [vmem:[%s2679_s1 + $0x3e8] sm:$0xf]  ;;  %v1822_v38 = vld [vmem:[%s2679_s1 + $0x3f4] sm:$0xf0]  ;;  %v1684_v45 = vor.u32 %v1819_v34, %v1681_v36  ;;  %v1799_v34 = vld [vmem:[%s2679_s1 + $0x344] sm:$0xf] }
  0x4e   :  { %782 = vmatpush.bf16.msra.mxu3 %v1497_v42  ;;  %v1689_v42 = vld [vmem:[%s2679_s1 + $0x3f8] sm:$0xf0]  ;;  %v1688_v46 = vor.u32 %v1822_v38, %v1687_v37  ;;  %v1601_v36 = vld [vmem:[%s2679_s1 + $0x350] sm:$0xf0]  ;;  %v1607_v37 = vld [vmem:[%s2679_s1 + $0x348] sm:$0xf] }
  0x4f   :  { %v1802_v38 = vld [vmem:[%s2679_s1 + $0x354] sm:$0xf0] }
  0x50   :  { %744 = vmatpush.bf16.msra.mxu0 %v1469_v48  ;;  %v1817_v48 = vld [vmem:[%s2679_s1 + $0x3cc] sm:$0xf0] }
  0x51   :  { %757 = vmatpush.bf16.msra.mxu1 %v1473_v49  ;;  %770 = vmatpush.bf16.msra.mxu2 %v1477_v50  ;;  %v1815_v49 = vld [vmem:[%s2679_s1 + $0x3c4] sm:$0xf]  ;;  %v1692_v50 = vor.u32 %v1820_v41, %v1689_v42  ;;  %v1664_v57 = vor.u32 %v1817_v48, %v1663_v47  ;;  %v1600_v41 = vor.u32 %v1801_v33, %v1599_v32  ;;  %v1585_v48 = vld [vmem:[%s2679_s1 + $0x330] sm:$0xf0] }
  0x52   :  { %783 = vmatpush.bf16.msra.mxu3 %v1481_v54  ;;  %v1816_v54 = vld [vmem:[%s2679_s1 + $0x3cc] sm:$0xf]  ;;  %v1668_v58 = vor.u32 %v1815_v49, %v1665_v51  ;;  %v1604_v42 = vor.u32 %v1799_v34, %v1601_v36  ;;  %v1591_v49 = vld [vmem:[%s2679_s1 + $0x328] sm:$0xf] }
  0x53   :  { %v1676_v63 = vor.u32 %v1816_v54, %v1673_v55  ;;  %v1796_v51 = vld [vmem:[%s2679_s1 + $0x32c] sm:$0xf] }
  0x54   :  { %745 = vmatpush.bf16.msra.mxu0 %v1453_v60  ;;  %v1647_v60 = vld [vmem:[%s2679_s1 + $0x3a0] sm:$0xf] }
  0x55   :  { %758 = vmatpush.bf16.msra.mxu1 %v1457_v61  ;;  %771 = vmatpush.bf16.msra.mxu2 %v1461_v62  ;;  %v1813_v61 = vld [vmem:[%s2679_s1 + $0x3ac] sm:$0xf0]  ;;  %v1811_v62 = vld [vmem:[%s2679_s1 + $0x3a4] sm:$0xf] }
  0x56   :  { %784 = vmatpush.bf16.msra.mxu3 %v1465_v2  ;;  %v1814_v2 = vld [vmem:[%s2679_s1 + $0x3b4] sm:$0xf0]  ;;  %v1648_v5 = vor.u32 %v1813_v61, %v1647_v60  ;;  %v1652_v6 = vor.u32 %v1811_v62, %v1649_v0  ;;  %v1569_v60 = vld [vmem:[%s2679_s1 + $0x310] sm:$0xf0]  ;;  %v1575_v61 = vld [vmem:[%s2679_s1 + $0x308] sm:$0xf] }
  0x57   :  { %v1656_v7 = vor.u32 %v1814_v2, %v1655_v1  ;;  %v1794_v62 = vld [vmem:[%s2679_s1 + $0x314] sm:$0xf0]  ;;  %v1577_v0 = vld [vmem:[%s2679_s1 + $0x318] sm:$0xf0] }
  0x58   :  { %746 = vmatpush.bf16.msra.mxu0 %v1437_v8  ;;  %v1631_v8 = vld [vmem:[%s2679_s1 + $0x380] sm:$0xf]  ;;  %v1576_v3 = vor.u32 %v1794_v62, %v1575_v61 }
  0x59   :  { %759 = vmatpush.bf16.msra.mxu1 %v1441_v9  ;;  %772 = vmatpush.bf16.msra.mxu2 %v1445_v10  ;;  %v1809_v9 = vld [vmem:[%s2679_s1 + $0x38c] sm:$0xf0]  ;;  %v1807_v10 = vld [vmem:[%s2679_s1 + $0x384] sm:$0xf] }
  0x5a   :  { %785 = vmatpush.bf16.msra.mxu3 %v1449_v14  ;;  %v1810_v14 = vld [vmem:[%s2679_s1 + $0x394] sm:$0xf0]  ;;  %v1632_v17 = vor.u32 %v1809_v9, %v1631_v8  ;;  %v1636_v18 = vor.u32 %v1807_v10, %v1633_v12 }
  0x5b   :  { %v1640_v19 = vor.u32 %v1810_v14, %v1639_v13 }
  0x5c   :  { %747 = vmatpush.bf16.msra.mxu0 %v1421_v20  ;;  %v1615_v20 = vld [vmem:[%s2679_s1 + $0x360] sm:$0xf] }
  0x5d   :  { %760 = vmatpush.bf16.msra.mxu1 %v1425_v23  ;;  %773 = vmatpush.bf16.msra.mxu2 %v1429_v24  ;;  %v1644_v23 = vor.u32 %v1808_v15, %v1641_v16  ;;  %v1617_v24 = vld [vmem:[%s2679_s1 + $0x370] sm:$0xf0]  ;;  %v1616_v29 = vor.u32 %v1805_v21, %v1615_v20 }
  0x5e   :  { %786 = vmatpush.bf16.msra.mxu3 %v1433_v28  ;;  %v1625_v28 = vld [vmem:[%s2679_s1 + $0x378] sm:$0xf0]  ;;  %v1620_v30 = vor.u32 %v1803_v22, %v1617_v24 }
  0x60   :  { %748 = vmatpush.bf16.msra.mxu0 %v1405_v35  ;;  %v1628_v35 = vor.u32 %v1804_v27, %v1625_v28 }
  0x61   :  { %761 = vmatpush.bf16.msra.mxu1 %v1409_v39  ;;  %774 = vmatpush.bf16.msra.mxu2 %v1413_v40  ;;  %v1800_v39 = vld [vmem:[%s2679_s1 + $0x34c] sm:$0xf]  ;;  %v1609_v40 = vld [vmem:[%s2679_s1 + $0x358] sm:$0xf0] }
  0x62   :  { %787 = vmatpush.bf16.msra.mxu3 %v1417_v43  ;;  %v1608_v43 = vor.u32 %v1802_v38, %v1607_v37  ;;  %v1612_v47 = vor.u32 %v1800_v39, %v1609_v40 }
  0x63   :  { %749 = vmatmul.bf16.vlgmr.msra.gmra.mxu0 %v1369_v56 }
  0x64   :  { %1005 = vmatpush.bf16.msrb.mxu0 %v1680_v44  ;;  %775 = vmatmul.bf16.vlgmr.msra.gmra.mxu2 %v1369_v56  ;;  %v1583_v44 = vld [vmem:[%s2679_s1 + $0x320] sm:$0xf] }
  0x65   :  { %1018 = vmatpush.bf16.msrb.mxu1 %v1684_v45  ;;  %1031 = vmatpush.bf16.msrb.mxu2 %v1688_v46  ;;  %v1797_v45 = vld [vmem:[%s2679_s1 + $0x32c] sm:$0xf0]  ;;  %v1795_v46 = vld [vmem:[%s2679_s1 + $0x324] sm:$0xf] }
  0x66   :  { %1044 = vmatpush.bf16.msrb.mxu3 %v1692_v50  ;;  %762 = vmatmul.bf16.vlgmr.msra.gmra.mxu1 %v1369_v56  ;;  %v1798_v50 = vld [vmem:[%s2679_s1 + $0x334] sm:$0xf0]  ;;  %v1584_v53 = vor.u32 %v1797_v45, %v1583_v44  ;;  %v1588_v54 = vor.u32 %v1795_v46, %v1585_v48 }
  0x67   :  { %788 = vmatmul.bf16.vlgmr.msra.gmra.mxu3 %v1369_v56  ;;  %v1592_v55 = vor.u32 %v1798_v50, %v1591_v49  ;;  %v1567_v56 = vld [vmem:[%s2679_s1 + $0x300] sm:$0xf] }
  0x68   :  { %1006 = vmatpush.bf16.msrb.mxu0 %v1664_v57  ;;  %v1793_v57 = vld [vmem:[%s2679_s1 + $0x30c] sm:$0xf0] }
  0x69   :  { %1019 = vmatpush.bf16.msrb.mxu1 %v1668_v58  ;;  %1032 = vmatpush.bf16.msrb.mxu2 %v1672_v59  ;;  %v1791_v58 = vld [vmem:[%s2679_s1 + $0x304] sm:$0xf]  ;;  %v1596_v59 = vor.u32 %v1796_v51, %v1593_v52  ;;  %v1568_v1 = vor.u32 %v1793_v57, %v1567_v56 }
  0x6a   :  { %1045 = vmatpush.bf16.msrb.mxu3 %v1676_v63  ;;  %v1792_v63 = vld [vmem:[%s2679_s1 + $0x30c] sm:$0xf]  ;;  %v1572_v2 = vor.u32 %v1791_v58, %v1569_v60 }
  0x6b   :  { %v1580_v4 = vor.u32 %v1792_v63, %v1577_v0 }
  0x6c   :  { %1007 = vmatpush.bf16.msrb.mxu0 %v1648_v5  ;;  %v1532_v5 = vld [vmem:[%s2680_s0 + $0x6] sm:$0x3] }
  0x6d   :  { %1020 = vmatpush.bf16.msrb.mxu1 %v1652_v6  ;;  %1033 = vmatpush.bf16.msrb.mxu2 %v1656_v7 }
  0x6e   :  { %1046 = vmatpush.bf16.msrb.mxu3 %v1660_v11 }
  0x70   :  { %1008 = vmatpush.bf16.msrb.mxu0 %v1632_v17 }
  0x71   :  { %1021 = vmatpush.bf16.msrb.mxu1 %v1636_v18  ;;  %1034 = vmatpush.bf16.msrb.mxu2 %v1640_v19 }
  0x72   :  { %1047 = vmatpush.bf16.msrb.mxu3 %v1644_v23 }
  0x74   :  { %1009 = vmatpush.bf16.msrb.mxu0 %v1616_v29 }
  0x75   :  { %1022 = vmatpush.bf16.msrb.mxu1 %v1620_v30  ;;  %1035 = vmatpush.bf16.msrb.mxu2 %v1624_v31 }
  0x76   :  { %1048 = vmatpush.bf16.msrb.mxu3 %v1628_v35 }
  0x78   :  { %1010 = vmatpush.bf16.msrb.mxu0 %v1600_v41 }
  0x79   :  { %1023 = vmatpush.bf16.msrb.mxu1 %v1604_v42  ;;  %1036 = vmatpush.bf16.msrb.mxu2 %v1608_v43 }
  0x7a   :  { %1049 = vmatpush.bf16.msrb.mxu3 %v1612_v47 }
  0x7c   :  { %1011 = vmatpush.bf16.msrb.mxu0 %v1584_v53 }
  0x7d   :  { %1024 = vmatpush.bf16.msrb.mxu1 %v1588_v54  ;;  %1037 = vmatpush.bf16.msrb.mxu2 %v1592_v55 }
  0x7e   :  { %1050 = vmatpush.bf16.msrb.mxu3 %v1596_v59 }
  0x80   :  { %1012 = vmatpush.bf16.msrb.mxu0 %v1568_v1 }
  0x81   :  { %1025 = vmatpush.bf16.msrb.mxu1 %v1572_v2  ;;  %1038 = vmatpush.bf16.msrb.mxu2 %v1576_v3 }
  0x82   :  { %1051 = vmatpush.bf16.msrb.mxu3 %v1580_v4 }
  0x83   :  { %1013 = vmatmul.bf16.vlgmr.msrb.gmra.mxu0 %v1532_v5 }
  0x84   :  { %1026 = vmatmul.bf16.vlgmr.msrb.gmra.mxu1 %v1532_v5  ;;  %1039 = vmatmul.bf16.vlgmr.msrb.gmra.mxu2 %v1532_v5 }
  0x85   :  { %1052 = vmatmul.bf16.vlgmr.msrb.gmra.mxu3 %v1532_v5 }
  0xa0   :  { %v222_v6 = vpop.f32.mrf.mxu0 }
  0xa1   :  { %v2629_v9 = vpop.permute.xlu0 %50 }
  0xa2   :  { %v223_v11 = vadd.f32 %v222_v6, %v2629_v9 }
  0xa3   :  { %v235_v7 = vpop.f32.mrf.mxu1 }
  0xa4   :  { %v236_v12 = vadd.f32 %v235_v7, %v2629_v9  ;;  %v265_v16 = vmax.f32 %v223_v11, 0.0 }
  0xa6   :  { %v266_v17 = vmax.f32 %v236_v12, 0.0 }
  0xa7   :  { %v248_v8 = vpop.f32.mrf.mxu2 }
  0xa8   :  { %v249_v13 = vadd.f32 %v248_v8, %v2629_v9  ;;  %v224_v15 = vpop.f32.mrf.mxu0  ;;  %v273_v21 = vrot.slane %v266_v17, 4 }
  0xaa   :  { %v261_v10 = vpop.f32.mrf.mxu3  ;;  %v267_v19 = vmax.f32 %v249_v13, 0.0  ;;  %v276_v23 = vsel %vm275_vm0, %v265_v16, %v273_v21 }
  0xab   :  { %v262_v14 = vadd.f32 %v261_v10, %v2629_v9  ;;  %v237_v18 = vpop.f32.mrf.mxu1  ;;  %280 = vst [vmem:[%s2682_s3] sm:$0x77] %v276_v23 }
  0xad   :  { %v268_v20 = vmax.f32 %v262_v14, 0.0 }
  0xaf   :  { %v274_v22 = vrot.slane %v268_v20, 4  ;;  %v250_v24 = vpop.f32.mrf.mxu2 }
  0xb1   :  { %v277_v25 = vsel %vm275_vm0, %v267_v19, %v274_v22 }
  0xb2   :  { %v263_v26 = vpop.f32.mrf.mxu3  ;;  %281 = vst [vmem:[%s2682_s3 + $0x8] sm:$0x77] %v277_v25 }
  0xc0   :  { %v486_v27 = vpop.f32.mrf.mxu0 }
  0xc1   :  { %v487_v28 = vadd.f32 %v486_v27, %v2629_v9 }
  0xc3   :  { %v499_v29 = vpop.f32.mrf.mxu1  ;;  %v529_v31 = vmax.f32 %v487_v28, 0.0 }
  0xc4   :  { %v500_v30 = vadd.f32 %v499_v29, %v2629_v9 }
  0xc6   :  { %v530_v32 = vmax.f32 %v500_v30, 0.0 }
  0xc7   :  { %v512_v33 = vpop.f32.mrf.mxu2 }
  0xc8   :  { %v537_v34 = vrot.slane %v530_v32, 4  ;;  %v513_v35 = vadd.f32 %v512_v33, %v2629_v9  ;;  %v488_v39 = vpop.f32.mrf.mxu0 }
  0xca   :  { %v525_v36 = vpop.f32.mrf.mxu3  ;;  %v539_v38 = vsel %vm275_vm0, %v529_v31, %v537_v34  ;;  %v531_v40 = vmax.f32 %v513_v35, 0.0 }
  0xcb   :  { %v526_v37 = vadd.f32 %v525_v36, %v2629_v9  ;;  %1367 = vst [vmem:[%s2682_s3 + $0x10] sm:$0x77] %v539_v38  ;;  %v501_v42 = vpop.f32.mrf.mxu1 }
  0xcd   :  { %v532_v41 = vmax.f32 %v526_v37, 0.0 }
  0xcf   :  { %v538_v43 = vrot.slane %v532_v41, 4  ;;  %v514_v45 = vpop.f32.mrf.mxu2 }
  0xd1   :  { %v540_v44 = vsel %vm275_vm0, %v531_v40, %v538_v43 }
  0xd2   :  { %1368 = vst [vmem:[%s2682_s3 + $0x18] sm:$0x77] %v540_v44  ;;  %v527_v46 = vpop.f32.mrf.mxu3 }
  0xe0   :  { %v750_v47 = vpop.f32.mrf.mxu0 }
  0xe1   :  { %v751_v48 = vadd.f32 %v750_v47, %v2629_v9 }
  0xe3   :  { %v763_v49 = vpop.f32.mrf.mxu1  ;;  %v793_v51 = vmax.f32 %v751_v48, 0.0 }
  0xe4   :  { %v764_v50 = vadd.f32 %v763_v49, %v2629_v9 }
  0xe6   :  { %v794_v52 = vmax.f32 %v764_v50, 0.0 }
  0xe7   :  { %v776_v53 = vpop.f32.mrf.mxu2 }
  0xe8   :  { %v801_v54 = vrot.slane %v794_v52, 4  ;;  %v777_v55 = vadd.f32 %v776_v53, %v2629_v9  ;;  %v752_v59 = vpop.f32.mrf.mxu0 }
  0xea   :  { %v789_v56 = vpop.f32.mrf.mxu3  ;;  %v803_v58 = vsel %vm275_vm0, %v793_v51, %v801_v54  ;;  %v795_v60 = vmax.f32 %v777_v55, 0.0 }
  0xeb   :  { %v790_v57 = vadd.f32 %v789_v56, %v2629_v9  ;;  %1530 = vst [vmem:[%s2682_s3 + $0x20] sm:$0x77] %v803_v58  ;;  %v765_v62 = vpop.f32.mrf.mxu1 }
  0xed   :  { %v796_v61 = vmax.f32 %v790_v57, 0.0 }
  0xef   :  { %v802_v63 = vrot.slane %v796_v61, 4  ;;  %v778_v1 = vpop.f32.mrf.mxu2 }
  0xf1   :  { %v804_v0 = vsel %vm275_vm0, %v795_v60, %v802_v63 }
  0xf2   :  { %1531 = vst [vmem:[%s2682_s3 + $0x28] sm:$0x77] %v804_v0  ;;  %v791_v2 = vpop.f32.mrf.mxu3 }
 0x100   :  { %v1014_v3 = vpop.f32.mrf.mxu0 }
 0x101   :  { %v1015_v4 = vadd.f32 %v1014_v3, %v2629_v9  ;;  %v1027_v5 = vpop.f32.mrf.mxu1 }
 0x102   :  { %v1028_v6 = vadd.f32 %v1027_v5, %v2629_v9 }
 0x103   :  { %v1057_v7 = vmax.f32 %v1015_v4, 0.0 }
 0x104   :  { %v1058_v8 = vmax.f32 %v1028_v6, 0.0 }
 0x106   :  { %v1065_v10 = vrot.slane %v1058_v8, 4 }
 0x107   :  { %v1040_v11 = vpop.f32.mrf.mxu2 }
 0x108   :  { %v1067_v12 = vsel %vm275_vm0, %v1057_v7, %v1065_v10  ;;  %v1053_v13 = vpop.f32.mrf.mxu3  ;;  %v1016_v14 = vpop.f32.mrf.mxu0  ;;  %v1041_v15 = vadd.f32 %v1040_v11, %v2629_v9 }
 0x109   :  { %1693 = vst [vmem:[%s2682_s3 + $0x30] sm:$0x77] %v1067_v12  ;;  %v1054_v16 = vadd.f32 %v1053_v13, %v2629_v9  ;;  %v1029_v17 = vpop.f32.mrf.mxu1 }
 0x10a   :  { %v1059_v19 = vmax.f32 %v1041_v15, 0.0 }
 0x10b   :  { %v1060_v18 = vmax.f32 %v1054_v16, 0.0 }
 0x10d   :  { %v1066_v20 = vrot.slane %v1060_v18, 4 }
 0x10f   :  { %v1068_v21 = vsel %vm275_vm0, %v1059_v19, %v1066_v20  ;;  %v1042_v22 = vpop.f32.mrf.mxu2 }
 0x110   :  { %1694 = vst [vmem:[%s2682_s3 + $0x38] sm:$0x77] %v1068_v21  ;;  %v1055_v23 = vpop.f32.mrf.mxu3 }

</bundles_post_ra>
